<compile_context>
chip_gen: v7x
topology: tpu7x:2x2x1
jax: 0.10.0
libtpu: 0.0.40
codegen_flags: <defaults>
</compile_context>

<pallas_src>
import numpy as np
import jax
import jax.numpy as jnp
from jax.experimental import pallas as pl
from jax.experimental.pallas import tpu as pltpu

# ----------------------------- synthetic config ------------------------------
N_FEATURE_RNA = 64      # n_feature_rna_seq (dataset-derived in the original script)
N_FEATURE_CYTO = 16     # n_feature_cytokine
N_H1 = 1024             # hardcoded in the module
N_H2 = 512              # hardcoded in the module
PRED_RANGE_DAYS = 12    # sys.argv[4] in the original script
NEG_SLOPE = 0.01        # nn.LeakyReLU default negative_slope

BATCH = 2
SEQ = 8                 # number of observed timepoints


def _leaky(x):
    # max(x, a*x) == LeakyReLU(x) for 0 < a < 1; one fewer VPU op than where().
    return jnp.maximum(x, NEG_SLOPE * x)


# --------------------- interpolation matrices (host / NumPy) -----------------
def make_interp_matrix_np(in_len, out_len):
    """(out_len, in_len) matrix reproducing F.interpolate(mode='linear',
    align_corners=False) along the time axis.  Built with NumPy so it is a
    compile-time constant (no traced scatter in the wrapper)."""
    m = np.zeros((out_len, in_len), np.float32)
    scale = in_len / out_len
    for j in range(out_len):
        real = max((j + 0.5) * scale - 0.5, 0.0)   # PyTorch clamps lower bound to 0
        i0 = min(int(np.floor(real)), in_len - 1)
        i1 = min(i0 + 1, in_len - 1)
        w1 = real - i0
        m[j, i0] += 1.0 - w1
        m[j, i1] += w1
    return m


def make_block_diag_interp_np(in_len, out_len, batch):
    """Block-diagonal (batch*out_len, batch*in_len) matrix so the per-batch time
    interpolation can be applied to the batch-folded (B*T, C) activations with a
    single matmul inside the kernel."""
    m = make_interp_matrix_np(in_len, out_len)
    bd = np.zeros((batch * out_len, batch * in_len), np.float32)
    for b in range(batch):
        bd[b * out_len:(b + 1) * out_len, b * in_len:(b + 1) * in_len] = m
    return bd


# ------------------------------- Pallas kernel -------------------------------
def _mlp_interp_kernel(x_ref, w1_ref, b1_ref, w2_ref, b2_ref, w3_ref, b3_ref,
                       m_ref, o_ref):
    # x_ref: (B*T, F) bf16   w*_ref: bf16   b*_ref: (1, H) f32
    # m_ref: (B*P, B*T) f32 (block-diagonal interp)   o_ref: (B*P, C) f32
    # bf16 x bf16 MXU matmuls, f32 accumulation; bias/LeakyReLU in f32 on the VPU.
    h = jnp.dot(x_ref[...], w1_ref[...],
                preferred_element_type=jnp.float32) + b1_ref[...]
    h = _leaky(h)
    h = jnp.dot(h.astype(jnp.bfloat16), w2_ref[...],
                preferred_element_type=jnp.float32) + b2_ref[...]
    h = _leaky(h)
    h = jnp.dot(h.astype(jnp.bfloat16), w3_ref[...],
                preferred_element_type=jnp.float32) + b3_ref[...]
    h = _leaky(h)                                    # (B*T, C) f32
    # linear time interpolation (align_corners=False), batched via block-diag matmul
    o_ref[...] = jnp.dot(m_ref[...], h, preferred_element_type=jnp.float32)


# --------------------------------- wrapper -----------------------------------
def time_series_regress_net(x, params, pred_range_days=PRED_RANGE_DAYS):
    B, T, F = x.shape
    w1, b1, w2, b2, w3, b3 = params
    C = w3.shape[1]
    P = pred_range_days
    M = B * T

    # bf16 weights fed straight to the MXU (kernel is weight-DMA bound).
    w1b = w1.astype(jnp.bfloat16)
    w2b = w2.astype(jnp.bfloat16)
    w3b = w3.astype(jnp.bfloat16)

    m_interp = jnp.asarray(make_block_diag_interp_np(T, P, B))   # (B*P, B*T) const

    x2d = x.reshape(M, F).astype(jnp.bfloat16)

    vmem = pl.BlockSpec(memory_space=pltpu.MemorySpace.VMEM)

    flops = 2 * (M * F * N_H1 + M * N_H1 * N_H2 + M * N_H2 * C + (B * P) * M * C)
    bytes_accessed = (2 * (F * N_H1 + N_H1 * N_H2 + N_H2 * C)   # bf16 weights
                      + 4 * (N_H1 + N_H2 + C)                   # f32 biases
                      + 2 * M * F                               # bf16 activations in
                      + 4 * (B * P) * M                         # f32 interp matrix
                      + 4 * (B * P) * C)                        # f32 output
    cost = pl.CostEstimate(flops=flops, transcendentals=0,
                           bytes_accessed=bytes_accessed)

    out2d = pl.pallas_call(
        _mlp_interp_kernel,
        out_shape=jax.ShapeDtypeStruct((B * P, C), jnp.float32),
        in_specs=[vmem] * 8,
        out_specs=vmem,
        cost_estimate=cost,
    )(x2d, w1b, b1.reshape(1, -1), w2b, b2.reshape(1, -1), w3b,
      b3.reshape(1, -1), m_interp)

    return out2d.reshape(B, P, C)


# --------------------------- pure-JAX reference ------------------------------
def reference(x, params, pred_range_days=PRED_RANGE_DAYS):
    """Matches the kernel's numerics: bf16 weights AND bf16 activations into each
    matmul, f32 accumulation, f32 bias/LeakyReLU."""
    w1, b1, w2, b2, w3, b3 = params
    bf = jnp.bfloat16

    h = jnp.dot(x.astype(bf), w1.astype(bf),
                preferred_element_type=jnp.float32) + b1
    h = _leaky(h)
    h = jnp.dot(h.astype(bf), w2.astype(bf),
                preferred_element_type=jnp.float32) + b2
    h = _leaky(h)
    h = jnp.dot(h.astype(bf), w3.astype(bf),
                preferred_element_type=jnp.float32) + b3
    h = _leaky(h)                                   # (B, T, C)

    m = jnp.asarray(make_interp_matrix_np(x.shape[1], pred_range_days))
    return jnp.einsum('pt,btc->bpc', m, h,
                      preferred_element_type=jnp.float32)


# ----------------------------------- main ------------------------------------
def init_params(key):
    """Deterministic PyTorch-style (uniform +-1/sqrt(fan_in)) init."""
    ks = jax.random.split(key, 6)

    def lin(kw, kb, fan_in, fan_out):
        bound = 1.0 / np.sqrt(fan_in)
        w = jax.random.uniform(kw, (fan_in, fan_out), jnp.float32, -bound, bound)
        b = jax.random.uniform(kb, (fan_out,), jnp.float32, -bound, bound)
        return w, b

    w1, b1 = lin(ks[0], ks[1], N_FEATURE_RNA, N_H1)
    w2, b2 = lin(ks[2], ks[3], N_H1, N_H2)
    w3, b3 = lin(ks[4], ks[5], N_H2, N_FEATURE_CYTO)
    return (w1, b1, w2, b2, w3, b3)


if __name__ == "__main__":
    key = jax.random.PRNGKey(0)
    k_x, k_p = jax.random.split(key)
    x = jax.random.normal(k_x, (BATCH, SEQ, N_FEATURE_RNA), jnp.float32)
    params = init_params(k_p)

    out = jax.block_until_ready(time_series_regress_net(x, params))
    ref = jax.block_until_ready(reference(x, params))

    assert out.shape == (BATCH, PRED_RANGE_DAYS, N_FEATURE_CYTO)
    # bf16 activations/weights on both sides; allow for accumulation-order /
    # MXU-pass differences between Mosaic and XLA lowering.
    np.testing.assert_allclose(np.asarray(out), np.asarray(ref),
                               rtol=1e-2, atol=1e-2)

    print("KERNEL_OK")
</pallas_src>

<mosaic_0001>
module attributes {stable_mosaic.version = 11 : i64} {
  func.func @_mlp_interp_kernel(%arg0: memref<16x64xbf16, #tpu.memory_space<vmem>>, %arg1: memref<64x1024xbf16, #tpu.memory_space<vmem>>, %arg2: memref<1x1024xf32, #tpu.memory_space<vmem>>, %arg3: memref<1024x512xbf16, #tpu.memory_space<vmem>>, %arg4: memref<1x512xf32, #tpu.memory_space<vmem>>, %arg5: memref<512x16xbf16, #tpu.memory_space<vmem>>, %arg6: memref<1x16xf32, #tpu.memory_space<vmem>>, %arg7: memref<24x16xf32, #tpu.memory_space<vmem>>, %arg8: memref<24x16xf32, #tpu.memory_space<vmem>>) attributes {dimension_semantics = [], scalar_prefetch = 0 : i64, scratch_operands = 0 : i64, tpu.core_type = #tpu.core_type<tc>} {
    %c0 = arith.constant 0 : index
    %c0_0 = arith.constant 0 : index
    %0 = vector.load %arg0[%c0, %c0_0] : memref<16x64xbf16, #tpu.memory_space<vmem>>, vector<16x64xbf16>
    %c0_1 = arith.constant 0 : index
    %c0_2 = arith.constant 0 : index
    %1 = vector.load %arg1[%c0_1, %c0_2] : memref<64x1024xbf16, #tpu.memory_space<vmem>>, vector<64x1024xbf16>
    %cst = arith.constant dense<0.000000e+00> : vector<16x1024xf32>
    %2 = tpu.matmul %0, %1, %cst {dimension_numbers = #tpu.dot_dimension_numbers<[1], [0], [0], [1], [0, 0, 1, 1], [], []>} : vector<16x64xbf16>, vector<64x1024xbf16>, vector<16x1024xf32> -> vector<16x1024xf32>
    %c0_3 = arith.constant 0 : index
    %c0_4 = arith.constant 0 : index
    %3 = vector.load %arg2[%c0_3, %c0_4] : memref<1x1024xf32, #tpu.memory_space<vmem>>, vector<1x1024xf32>
    %4 = vector.broadcast %3 : vector<1x1024xf32> to vector<16x1024xf32>
    %5 = arith.addf %2, %4 : vector<16x1024xf32>
    %cst_5 = arith.constant 0.00999999977 : f32
    %6 = vector.broadcast %cst_5 : f32 to vector<16x1024xf32>
    %7 = arith.mulf %6, %5 : vector<16x1024xf32>
    %8 = arith.maximumf %5, %7 : vector<16x1024xf32>
    %9 = arith.truncf %8 : vector<16x1024xf32> to vector<16x1024xbf16>
    %c0_6 = arith.constant 0 : index
    %c0_7 = arith.constant 0 : index
    %10 = vector.load %arg3[%c0_6, %c0_7] : memref<1024x512xbf16, #tpu.memory_space<vmem>>, vector<1024x512xbf16>
    %cst_8 = arith.constant dense<0.000000e+00> : vector<16x512xf32>
    %11 = tpu.matmul %9, %10, %cst_8 {dimension_numbers = #tpu.dot_dimension_numbers<[1], [0], [0], [1], [0, 0, 1, 1], [], []>} : vector<16x1024xbf16>, vector<1024x512xbf16>, vector<16x512xf32> -> vector<16x512xf32>
    %c0_9 = arith.constant 0 : index
    %c0_10 = arith.constant 0 : index
    %12 = vector.load %arg4[%c0_9, %c0_10] : memref<1x512xf32, #tpu.memory_space<vmem>>, vector<1x512xf32>
    %13 = vector.broadcast %12 : vector<1x512xf32> to vector<16x512xf32>
    %14 = arith.addf %11, %13 : vector<16x512xf32>
    %cst_11 = arith.constant 0.00999999977 : f32
    %15 = vector.broadcast %cst_11 : f32 to vector<16x512xf32>
    %16 = arith.mulf %15, %14 : vector<16x512xf32>
    %17 = arith.maximumf %14, %16 : vector<16x512xf32>
    %18 = arith.truncf %17 : vector<16x512xf32> to vector<16x512xbf16>
    %c0_12 = arith.constant 0 : index
    %c0_13 = arith.constant 0 : index
    %19 = vector.load %arg5[%c0_12, %c0_13] : memref<512x16xbf16, #tpu.memory_space<vmem>>, vector<512x16xbf16>
    %cst_14 = arith.constant dense<0.000000e+00> : vector<16x16xf32>
    %20 = tpu.matmul %18, %19, %cst_14 {dimension_numbers = #tpu.dot_dimension_numbers<[1], [0], [0], [1], [0, 0, 1, 1], [], []>} : vector<16x512xbf16>, vector<512x16xbf16>, vector<16x16xf32> -> vector<16x16xf32>
    %c0_15 = arith.constant 0 : index
    %c0_16 = arith.constant 0 : index
    %21 = vector.load %arg6[%c0_15, %c0_16] : memref<1x16xf32, #tpu.memory_space<vmem>>, vector<1x16xf32>
    %22 = vector.broadcast %21 : vector<1x16xf32> to vector<16x16xf32>
    %23 = arith.addf %20, %22 : vector<16x16xf32>
    %cst_17 = arith.constant 0.00999999977 : f32
    %24 = vector.broadcast %cst_17 : f32 to vector<16x16xf32>
    %25 = arith.mulf %24, %23 : vector<16x16xf32>
    %26 = arith.maximumf %23, %25 : vector<16x16xf32>
    %c0_18 = arith.constant 0 : index
    %c0_19 = arith.constant 0 : index
    %27 = vector.load %arg7[%c0_18, %c0_19] : memref<24x16xf32, #tpu.memory_space<vmem>>, vector<24x16xf32>
    %cst_20 = arith.constant dense<0.000000e+00> : vector<24x16xf32>
    %28 = tpu.matmul %27, %26, %cst_20 {dimension_numbers = #tpu.dot_dimension_numbers<[1], [0], [0], [1], [0, 0, 1, 1], [], []>} : vector<24x16xf32>, vector<16x16xf32>, vector<24x16xf32> -> vector<24x16xf32>
    %c0_21 = arith.constant 0 : index
    %c0_22 = arith.constant 0 : index
    %29 = vector.load %arg8[%c0_21, %c0_22] : memref<24x16xf32, #tpu.memory_space<vmem>>, vector<24x16xf32>
    tpu.vector_store %arg8[%c0_21, %c0_22], %28 {strides = array<i32>} : memref<24x16xf32, #tpu.memory_space<vmem>>, vector<24x16xf32>,
    return
  }
}

</mosaic_0001>

<bundles_post_ra>
// kernel: tpu_custom_call.1
= control target key start
LH: loop header
LB: loop body
LE: loop exit
PB: predicated region body
PF: predicated region fallthrough
CT: control target
= control target key end

     0   :  { %13 = vsyncpa [#allocation3], 0  ;;  %s3749_s27 = smov [#allocation2]   ;;  %s4108_s0 = inlined_call_operand.vmem [shape: bf16[16,64], index: 0, kind: input, shape index: {}]   ;;  %s4109_s1 = inlined_call_operand.vmem [shape: bf16[64,1024], index: 1, kind: input, shape index: {}]   ;;  %s4110_s2 = inlined_call_operand.vmem [shape: f32[1,1024], index: 2, kind: input, shape index: {}]   ;;  %s4111_s3 = inlined_call_operand.hbm [shape: bf16[1024,512], index: 3, kind: input, shape index: {}]   ;;  %s4112_s4 = inlined_call_operand.vmem [shape: f32[1,512], index: 4, kind: input, shape index: {}]   ;;  %s4113_s5 = inlined_call_operand.vmem [shape: bf16[512,16], index: 5, kind: input, shape index: {}]   ;;  %s4114_s6 = inlined_call_operand.vmem [shape: f32[1,16], index: 6, kind: input, shape index: {}]   ;;  %s4115_s7 = inlined_call_operand.vmem [shape: f32[24,16], index: 7, kind: input, shape index: {}]   ;;  %s4116_s8 = inlined_call_operand.vmem [shape: f32[24,16], index: 8, kind: output, shape index: {}]  }
   0x1   :  { %s25_s28 = sshll.u32 %s3749_s27, 4  ;;  %s3725_s9 = scalar_lea.hbm %s4111_s3, 32768  ;;  %s26_s28 = int_to_ptr.vmem [resolvable:$true] %s25_s28 }
   0x2   :  { %p3726_p0 = scmp.ne.s32.totalorder %s4111_s3, %s3725_s9  ;;  %p3729_p1 = scmp.lt.u32.totalorder %s3725_s9, %s4111_s3 }
   0x4   :  { %p3731_p2 = pnand %p3729_p1, %p3726_p0 }
   0x6   :  { %3734 = shalt.err (!%p3731_p2)
}
   0x7   :  { %s3735_s14 = scalar_lea.vmem %s26_s28, 32768  ;;  %p3740_p4 = scmp.lt.s32.totalorder %s26_s28, %s26_s28 }
   0x8   :  { %p3736_p3 = scmp.ne.s32.totalorder %s26_s28, %s3735_s14  ;;  %p3741_p5 = scmp.lt.s32.totalorder %s3735_s14, %s3735_s14 }
   0xa   :  { %p3742_p6 = por %p3741_p5, %p3740_p4 }
   0xc   :  { %p3743_p7 = pnand %p3742_p6, %p3736_p3 }
   0xe   :  { %3746 = shalt.err (!%p3743_p7)
}
   0xf   :  { %s3750_s15 = smov 256   ;;  %s3751_s16 = smov 16  }
  0x10   :  { %31 = dma.hbm_to_vmem [thread:$0]  %s4111_s3, 32768, %s26_s28, [#allocation3], %s3750_s15, %s3750_s15, %s3751_s16  }
  0x11   :  { %3747 = dma.done.wait [#allocation3], 32768  }
  0x12   :  { %3748 = vsyncadd [#allocation3], 4294934528  ;;  %v3752_v0 = vmov 0   ;;  %v46_v1 = vld [vmem:[%s4109_s1] sm:$0xff]  ;;  %v47_v10 = vld [vmem:[%s4109_s1 + $0x8] sm:$0xff]  ;;  %vm285_vm0 = vcmask 523264  }
  0x13   :  { %321 = vmatprep.mubr.bf16.mxu0 %v3752_v0  ;;  %364 = vmatprep.mubr.bf16.mxu1 %v3752_v0  ;;  %v50_v2 = vld [vmem:[%s4109_s1 + $0x20] sm:$0xff]  ;;  %v51_v12 = vld [vmem:[%s4109_s1 + $0x28] sm:$0xff]  ;;  %v48_v29 = vld [vmem:[%s4109_s1 + $0x10] sm:$0xff]  ;;  %vm3754_vm1 = vmmov 0   ;;  %vm2775_vm2 = vcmask 130048  }
  0x14   :  { %v54_v3 = vld [vmem:[%s4109_s1 + $0x40] sm:$0xff]  ;;  %v2875_v4 = vcombine.high %v46_v1, %v50_v2  ;;  %v2874_v5 = vcombine.low %v46_v1, %v50_v2  ;;  %v55_v13 = vld [vmem:[%s4109_s1 + $0x48] sm:$0xff]  ;;  %v2877_v17 = vcombine.high %v47_v10, %v51_v12  ;;  %v2876_v18 = vcombine.low %v47_v10, %v51_v12  ;;  %v52_v30 = vld [vmem:[%s4109_s1 + $0x30] sm:$0xff] }
  0x15   :  { %v58_v6 = vld [vmem:[%s4109_s1 + $0x60] sm:$0xff]  ;;  %v59_v14 = vld [vmem:[%s4109_s1 + $0x68] sm:$0xff]  ;;  %v2879_v35 = vcombine.high %v48_v29, %v52_v30  ;;  %v56_v36 = vld [vmem:[%s4109_s1 + $0x50] sm:$0xff]  ;;  %v2878_v41 = vcombine.low %v48_v29, %v52_v30 }
  0x16   :  { %v2883_v7 = vcombine.high %v54_v3, %v58_v6  ;;  %v62_v8 = vld [vmem:[%s4109_s1 + $0x80] sm:$0xff]  ;;  %289 = vmatprep.subr.bf16.mxu0 %v2875_v4  ;;  %v2882_v11 = vcombine.low %v54_v3, %v58_v6  ;;  %v2885_v19 = vcombine.high %v55_v13, %v59_v14  ;;  %v63_v21 = vld [vmem:[%s4109_s1 + $0x88] sm:$0xff]  ;;  %332 = vmatprep.subr.bf16.mxu1 %v2877_v17  ;;  %v60_v37 = vld [vmem:[%s4109_s1 + $0x70] sm:$0xff] }
  0x17   :  { %v66_v9 = vld [vmem:[%s4109_s1 + $0xa0] sm:$0xff]  ;;  %290 = vmatpush1.bf16.msra.mxu0 %v2874_v5  ;;  %v67_v22 = vld [vmem:[%s4109_s1 + $0xa8] sm:$0xff]  ;;  %333 = vmatpush1.bf16.msra.mxu1 %v2876_v18  ;;  %v2884_v24 = vcombine.low %v55_v13, %v59_v14  ;;  %v49_v38 = vld [vmem:[%s4109_s1 + $0x18] sm:$0xff]  ;;  %v2887_v44 = vcombine.high %v56_v36, %v60_v37  ;;  %v2886_v48 = vcombine.low %v56_v36, %v60_v37 }
  0x18   :  { %291 = vmatprep.subr.bf16.mxu0 %v2883_v7  ;;  %v2891_v15 = vcombine.high %v62_v8, %v66_v9  ;;  %v70_v16 = vld [vmem:[%s4109_s1 + $0xc0] sm:$0xff]  ;;  %v2890_v23 = vcombine.low %v62_v8, %v66_v9  ;;  %334 = vmatprep.subr.bf16.mxu1 %v2885_v19  ;;  %v2893_v26 = vcombine.high %v63_v21, %v67_v22  ;;  %v71_v27 = vld [vmem:[%s4109_s1 + $0xc8] sm:$0xff]  ;;  %v53_v39 = vld [vmem:[%s4109_s1 + $0x38] sm:$0xff] }
  0x19   :  { %v74_v20 = vld [vmem:[%s4109_s1 + $0xe0] sm:$0xff]  ;;  %v75_v28 = vld [vmem:[%s4109_s1 + $0xe8] sm:$0xff]  ;;  %v2892_v32 = vcombine.low %v63_v21, %v67_v22  ;;  %v64_v42 = vld [vmem:[%s4109_s1 + $0x90] sm:$0xff]  ;;  %v2881_v46 = vcombine.high %v49_v38, %v53_v39  ;;  %v2880_v51 = vcombine.low %v49_v38, %v53_v39 }
  0x1a   :  { %v2899_v25 = vcombine.high %v70_v16, %v74_v20  ;;  %v2898_v31 = vcombine.low %v70_v16, %v74_v20  ;;  %v3872_v33 = vld [vmem:[%s4108_s0] sm:$0xff]   ;;  %v2901_v34 = vcombine.high %v71_v27, %v75_v28  ;;  %v2900_v40 = vcombine.low %v71_v27, %v75_v28  ;;  %v68_v43 = vld [vmem:[%s4109_s1 + $0xb0] sm:$0xff]  ;;  %v57_v45 = vld [vmem:[%s4109_s1 + $0x58] sm:$0xff] }
  0x1b   :  { %292 = vmatpush1.bf16.msra.mxu0 %v2882_v11  ;;  %335 = vmatpush1.bf16.msra.mxu1 %v2884_v24  ;;  %v61_v47 = vld [vmem:[%s4109_s1 + $0x78] sm:$0xff]  ;;  %v72_v49 = vld [vmem:[%s4109_s1 + $0xd0] sm:$0xff]  ;;  %v2895_v52 = vcombine.high %v64_v42, %v68_v43  ;;  %v2894_v56 = vcombine.low %v64_v42, %v68_v43 }
  0x1c   :  { %293 = vmatprep.subr.bf16.mxu0 %v2891_v15  ;;  %336 = vmatprep.subr.bf16.mxu1 %v2893_v26  ;;  %v76_v50 = vld [vmem:[%s4109_s1 + $0xf0] sm:$0xff]  ;;  %v2889_v53 = vcombine.high %v57_v45, %v61_v47  ;;  %v65_v54 = vld [vmem:[%s4109_s1 + $0x98] sm:$0xff]  ;;  %v2888_v57 = vcombine.low %v57_v45, %v61_v47 }
  0x1d   :  { %v69_v55 = vld [vmem:[%s4109_s1 + $0xb8] sm:$0xff]  ;;  %v2903_v58 = vcombine.high %v72_v49, %v76_v50  ;;  %v2902_v62 = vcombine.low %v72_v49, %v76_v50  ;;  %v3311_v2 = vld [vmem:[#allocation2 + $0x4] ss:$16 sps:$4 sm:$0xff]   ;;  %v3309_v4 = vld [vmem:[#allocation2] ss:$16 sps:$4 sm:$0xff]  }
  0x1e   :  { %v2897_v59 = vcombine.high %v65_v54, %v69_v55  ;;  %v73_v60 = vld [vmem:[%s4109_s1 + $0xd8] sm:$0xff]  ;;  %v2896_v63 = vcombine.low %v65_v54, %v69_v55  ;;  %v3317_v6 = vld [vmem:[#allocation2 + $0x24] ss:$16 sps:$4 sm:$0xff]   ;;  %v3315_v7 = vld [vmem:[#allocation2 + $0x20] ss:$16 sps:$4 sm:$0xff]  }
  0x1f   :  { %294 = vmatpush1.bf16.msra.mxu0 %v2890_v23  ;;  %337 = vmatpush1.bf16.msra.mxu1 %v2892_v32  ;;  %v77_v61 = vld [vmem:[%s4109_s1 + $0xf8] sm:$0xff]  ;;  %v3323_v9 = vld [vmem:[#allocation2 + $0x44] ss:$16 sps:$4 sm:$0xff]   ;;  %v3321_v11 = vld [vmem:[#allocation2 + $0x40] ss:$16 sps:$4 sm:$0xff]  }
  0x20   :  { %295 = vmatprep.subr.bf16.mxu0 %v2899_v25  ;;  %338 = vmatprep.subr.bf16.mxu1 %v2901_v34  ;;  %v2905_v1 = vcombine.high %v73_v60, %v77_v61  ;;  %v2904_v3 = vcombine.low %v73_v60, %v77_v61  ;;  %v3314_v5 = vld [vmem:[#allocation2 + $0xc] ss:$16 sps:$4 sm:$0xff]   ;;  %v3318_v10 = vld [vmem:[#allocation2 + $0x28] ss:$16 sps:$4 sm:$0xff]   ;;  %v3329_v13 = vld [vmem:[#allocation2 + $0x64] ss:$16 sps:$4 sm:$0xff]  }
  0x21   :  { %v3320_v8 = vld [vmem:[#allocation2 + $0x2c] ss:$16 sps:$4 sm:$0xff]   ;;  %v3324_v14 = vld [vmem:[#allocation2 + $0x48] ss:$16 sps:$4 sm:$0xff]   ;;  %v3327_v15 = vld [vmem:[#allocation2 + $0x60] ss:$16 sps:$4 sm:$0xff]  }
  0x22   :  { %v3326_v12 = vld [vmem:[#allocation2 + $0x4c] ss:$16 sps:$4 sm:$0xff]   ;;  %v3335_v17 = vld [vmem:[#allocation2 + $0x84] ss:$16 sps:$4 sm:$0xff]   ;;  %v3330_v18 = vld [vmem:[#allocation2 + $0x68] ss:$16 sps:$4 sm:$0xff]  }
  0x23   :  { %296 = vmatpush1.bf16.msra.mxu0 %v2898_v31  ;;  %339 = vmatpush1.bf16.msra.mxu1 %v2900_v40  ;;  %v3332_v16 = vld [vmem:[#allocation2 + $0x6c] ss:$16 sps:$4 sm:$0xff]   ;;  %v3333_v19 = vld [vmem:[#allocation2 + $0x80] ss:$16 sps:$4 sm:$0xff]   ;;  %v3341_v21 = vld [vmem:[#allocation2 + $0xa4] ss:$16 sps:$4 sm:$0xff]  }
  0x24   :  { %375 = vmatprep.subr.bf16.mxu0 %v2879_v35  ;;  %418 = vmatprep.subr.bf16.mxu1 %v2881_v46  ;;  %v3338_v20 = vld [vmem:[#allocation2 + $0x8c] ss:$16 sps:$4 sm:$0xff]   ;;  %v3336_v22 = vld [vmem:[#allocation2 + $0x88] ss:$16 sps:$4 sm:$0xff]   ;;  %v3339_v23 = vld [vmem:[#allocation2 + $0xa0] ss:$16 sps:$4 sm:$0xff]  }
  0x25   :  { %v3344_v24 = vld [vmem:[#allocation2 + $0xac] ss:$16 sps:$4 sm:$0xff]   ;;  %v3347_v25 = vld [vmem:[#allocation2 + $0xc4] ss:$16 sps:$4 sm:$0xff]   ;;  %v3342_v26 = vld [vmem:[#allocation2 + $0xa8] ss:$16 sps:$4 sm:$0xff]  }
  0x26   :  { %2906 = vmatmul.mubr.msk.bf16.vlgmr.msra.gmra.mrb[0].mxu0 %vm285_vm0, %v3872_v33  ;;  %2907 = vmatmul.mubr.msk.bf16.vlgmr.msra.gmra.mrb[0].mxu1 %vm285_vm0, %v3872_v33  ;;  %v3345_v27 = vld [vmem:[#allocation2 + $0xc0] ss:$16 sps:$4 sm:$0xff]   ;;  %v3350_v28 = vld [vmem:[#allocation2 + $0xcc] ss:$16 sps:$4 sm:$0xff]   ;;  %v3353_v29 = vld [vmem:[#allocation2 + $0xe4] ss:$16 sps:$4 sm:$0xff]  }
  0x27   :  { %376 = vmatpush1.bf16.msra.mxu0 %v2878_v41  ;;  %407 = vmatprep.mubr.bf16.mxu0 %v3752_v0  ;;  %v3348_v30 = vld [vmem:[#allocation2 + $0xc8] ss:$16 sps:$4 sm:$0xff]   ;;  %v3351_v31 = vld [vmem:[#allocation2 + $0xe0] ss:$16 sps:$4 sm:$0xff]   ;;  %v3356_v32 = vld [vmem:[#allocation2 + $0xec] ss:$16 sps:$4 sm:$0xff]  }
  0x28   :  { %377 = vmatprep.subr.bf16.mxu0 %v2887_v44  ;;  %419 = vmatpush1.bf16.msra.mxu1 %v2880_v51  ;;  %v3354_v34 = vld [vmem:[#allocation2 + $0xe8] ss:$16 sps:$4 sm:$0xff]   ;;  %v3357_v35 = vld [vmem:[#allocation2 + $0x100] ss:$16 sps:$4 sm:$0xff]   ;;  %v3362_v36 = vld [vmem:[#allocation2 + $0x10c] ss:$16 sps:$4 sm:$0xff]  }
  0x29   :  { %420 = vmatprep.subr.bf16.mxu1 %v2889_v53  ;;  %450 = vmatprep.mubr.bf16.mxu1 %v3752_v0  ;;  %v3312_v0 = vld [vmem:[#allocation2 + $0x8] ss:$16 sps:$4 sm:$0xff]   ;;  %v3365_v37 = vld [vmem:[#allocation2 + $0x124] ss:$16 sps:$4 sm:$0xff]   ;;  %v3363_v39 = vld [vmem:[#allocation2 + $0x120] ss:$16 sps:$4 sm:$0xff]  }
  0x2a   :  { %v3360_v38 = vld [vmem:[#allocation2 + $0x108] ss:$16 sps:$4 sm:$0xff]   ;;  %v3368_v40 = vld [vmem:[#allocation2 + $0x12c] ss:$16 sps:$4 sm:$0xff]   ;;  %v3371_v41 = vld [vmem:[#allocation2 + $0x144] ss:$16 sps:$4 sm:$0xff]  }
  0x2b   :  { %378 = vmatpush1.bf16.msra.mxu0 %v2886_v48  ;;  %v3366_v42 = vld [vmem:[#allocation2 + $0x128] ss:$16 sps:$4 sm:$0xff]   ;;  %v3369_v43 = vld [vmem:[#allocation2 + $0x140] ss:$16 sps:$4 sm:$0xff]   ;;  %v3374_v44 = vld [vmem:[#allocation2 + $0x14c] ss:$16 sps:$4 sm:$0xff]  }
  0x2c   :  { %379 = vmatprep.subr.bf16.mxu0 %v2895_v52  ;;  %421 = vmatpush1.bf16.msra.mxu1 %v2888_v57  ;;  %v3377_v45 = vld [vmem:[#allocation2 + $0x164] ss:$16 sps:$4 sm:$0xff]   ;;  %v3372_v46 = vld [vmem:[#allocation2 + $0x148] ss:$16 sps:$4 sm:$0xff]   ;;  %v3375_v47 = vld [vmem:[#allocation2 + $0x160] ss:$16 sps:$4 sm:$0xff]  }
  0x2d   :  { %422 = vmatprep.subr.bf16.mxu1 %v2897_v59  ;;  %v3380_v48 = vld [vmem:[#allocation2 + $0x16c] ss:$16 sps:$4 sm:$0xff]   ;;  %v3383_v49 = vld [vmem:[#allocation2 + $0x184] ss:$16 sps:$4 sm:$0xff]   ;;  %v3378_v50 = vld [vmem:[#allocation2 + $0x168] ss:$16 sps:$4 sm:$0xff]  }
  0x2e   :  { %v3381_v51 = vld [vmem:[#allocation2 + $0x180] ss:$16 sps:$4 sm:$0xff]   ;;  %v3386_v52 = vld [vmem:[#allocation2 + $0x18c] ss:$16 sps:$4 sm:$0xff]   ;;  %v3384_v53 = vld [vmem:[#allocation2 + $0x188] ss:$16 sps:$4 sm:$0xff]  }
  0x2f   :  { %380 = vmatpush1.bf16.msra.mxu0 %v2894_v56  ;;  %v3389_v54 = vld [vmem:[#allocation2 + $0x1a4] ss:$16 sps:$4 sm:$0xff]   ;;  %v3392_v55 = vld [vmem:[#allocation2 + $0x1ac] ss:$16 sps:$4 sm:$0xff]   ;;  %v3387_v56 = vld [vmem:[#allocation2 + $0x1a0] ss:$16 sps:$4 sm:$0xff]  }
  0x30   :  { %381 = vmatprep.subr.bf16.mxu0 %v2903_v58  ;;  %423 = vmatpush1.bf16.msra.mxu1 %v2896_v63  ;;  %v3390_v57 = vld [vmem:[#allocation2 + $0x1a8] ss:$16 sps:$4 sm:$0xff]   ;;  %v3395_v58 = vld [vmem:[#allocation2 + $0x1c4] ss:$16 sps:$4 sm:$0xff]   ;;  %v3398_v59 = vld [vmem:[#allocation2 + $0x1cc] ss:$16 sps:$4 sm:$0xff]  }
  0x31   :  { %424 = vmatprep.subr.bf16.mxu1 %v2905_v1  ;;  %v3393_v60 = vld [vmem:[#allocation2 + $0x1c0] ss:$16 sps:$4 sm:$0xff]   ;;  %v3396_v61 = vld [vmem:[#allocation2 + $0x1c8] ss:$16 sps:$4 sm:$0xff]   ;;  %v3404_v63 = vld [vmem:[#allocation2 + $0x1ec] ss:$16 sps:$4 sm:$0xff]  }
  0x32   :  { %v3399_v1 = vld [vmem:[#allocation2 + $0x1e0] ss:$16 sps:$4 sm:$0xff]  }
  0x33   :  { %382 = vmatpush1.bf16.msra.mxu0 %v2902_v62  ;;  %v3401_v62 = vld [vmem:[#allocation2 + $0x1e4] ss:$16 sps:$4 sm:$0xff]  }
  0x34   :  { %2059 = vmatprep.subr.bf16.mxu0 %v3311_v2  ;;  %425 = vmatpush1.bf16.msra.mxu1 %v2904_v3  ;;  %v3402_v2 = vld [vmem:[#allocation2 + $0x1e8] ss:$16 sps:$4 sm:$0xff]   ;;  %v3407_v3 = vld [vmem:[#allocation2 + $0x204] ss:$16 sps:$4 sm:$0xff]  }
  0x35   :  { %2231 = vmatprep.subr.bf16.mxu1 %v3314_v5  ;;  %v80_v5 = vlaneseq }
  0x36   :  { %2908 = vmatmul.mubr.msk.bf16.vlgmr.msra.gmra.mrb[4].mxu0 %vm285_vm0, %v3872_v33 }
  0x37   :  { %2060 = vmatpush1.bf16.msra.mxu0 %v3309_v4  ;;  %2909 = vmatmul.mubr.msk.bf16.vlgmr.msra.gmra.mrb[4].mxu1 %vm285_vm0, %v3872_v33  ;;  %v3359_v33 = vld [vmem:[#allocation2 + $0x104] ss:$16 sps:$4 sm:$0xff]   ;;  %v3410_v4 = vld [vmem:[#allocation2 + $0x20c] ss:$16 sps:$4 sm:$0xff]  }
  0x38   :  { %2061 = vmatprep.subr.bf16.mxu0 %v3317_v6  ;;  %2232 = vmatpush1.bf16.msra.mxu1 %v3312_v0  ;;  %v3926_v6 = vshrl.u32 %v80_v5, 7  ;;  %v3425_v5 = vld [vmem:[#allocation2 + $0x264] ss:$16 sps:$4 sm:$0xff]  }
  0x39   :  { %2233 = vmatprep.subr.bf16.mxu1 %v3320_v8 }
  0x3a   :  { %v82_v0 = vsub.s32 0, %v3926_v6  ;;  %v86_v8 = vsub.s32 1, %v3926_v6 }
  0x3b   :  { %2062 = vmatpush1.bf16.msra.mxu0 %v3315_v7  ;;  %v3932_v7 = vld [vmem:[%s4110_s2] sm:$0xff] }
  0x3c   :  { %2063 = vmatprep.subr.bf16.mxu0 %v3323_v9  ;;  %2234 = vmatpush1.bf16.msra.mxu1 %v3318_v10  ;;  %v83_v9 = vrot.slane %v3932_v7, %v82_v0  ;;  %v90_v10 = vsub.s32 2, %v3926_v6 }
  0x3d   :  { %2235 = vmatprep.subr.bf16.mxu1 %v3326_v12  ;;  %v94_v12 = vsub.s32 3, %v3926_v6 }
  0x3f   :  { %2064 = vmatpush1.bf16.msra.mxu0 %v3321_v11  ;;  %v87_v11 = vrot.slane %v3932_v7, %v86_v8 }
  0x40   :  { %2065 = vmatprep.subr.bf16.mxu0 %v3329_v13  ;;  %2236 = vmatpush1.bf16.msra.mxu1 %v3324_v14 }
  0x41   :  { %2237 = vmatprep.subr.bf16.mxu1 %v3332_v16  ;;  %v91_v16 = vrot.slane %v3932_v7, %v90_v10 }
  0x43   :  { %2066 = vmatpush1.bf16.msra.mxu0 %v3327_v15 }
  0x44   :  { %2067 = vmatprep.subr.bf16.mxu0 %v3335_v17  ;;  %2238 = vmatpush1.bf16.msra.mxu1 %v3330_v18 }
  0x45   :  { %2239 = vmatprep.subr.bf16.mxu1 %v3338_v20 }
  0x47   :  { %2068 = vmatpush1.bf16.msra.mxu0 %v3333_v19  ;;  %v95_v19 = vrot.slane %v3932_v7, %v94_v12 }
  0x48   :  { %2069 = vmatprep.subr.bf16.mxu0 %v3341_v21  ;;  %2240 = vmatpush1.bf16.msra.mxu1 %v3336_v22 }
  0x49   :  { %2241 = vmatprep.subr.bf16.mxu1 %v3344_v24 }
  0x4b   :  { %2070 = vmatpush1.bf16.msra.mxu0 %v3339_v23 }
  0x4c   :  { %2071 = vmatprep.subr.bf16.mxu0 %v3347_v25  ;;  %2242 = vmatpush1.bf16.msra.mxu1 %v3342_v26 }
  0x4d   :  { %2243 = vmatprep.subr.bf16.mxu1 %v3350_v28 }
  0x4f   :  { %2072 = vmatpush1.bf16.msra.mxu0 %v3345_v27 }
  0x50   :  { %2073 = vmatprep.subr.bf16.mxu0 %v3353_v29  ;;  %2244 = vmatpush1.bf16.msra.mxu1 %v3348_v30 }
  0x51   :  { %2245 = vmatprep.subr.bf16.mxu1 %v3356_v32 }
  0x53   :  { %2074 = vmatpush1.bf16.msra.mxu0 %v3351_v31 }
  0x54   :  { %2075 = vmatprep.subr.bf16.mxu0 %v3359_v33  ;;  %2246 = vmatpush1.bf16.msra.mxu1 %v3354_v34 }
  0x55   :  { %2247 = vmatprep.subr.bf16.mxu1 %v3362_v36 }
  0x57   :  { %2076 = vmatpush1.bf16.msra.mxu0 %v3357_v35 }
  0x58   :  { %2077 = vmatprep.subr.bf16.mxu0 %v3365_v37  ;;  %2248 = vmatpush1.bf16.msra.mxu1 %v3360_v38 }
  0x59   :  { %2249 = vmatprep.subr.bf16.mxu1 %v3368_v40 }
  0x5b   :  { %2078 = vmatpush1.bf16.msra.mxu0 %v3363_v39 }
  0x5c   :  { %2079 = vmatprep.subr.bf16.mxu0 %v3371_v41  ;;  %2250 = vmatpush1.bf16.msra.mxu1 %v3366_v42  ;;  %v3405_v42 = vld [vmem:[#allocation2 + $0x200] ss:$16 sps:$4 sm:$0xff]  }
  0x5d   :  { %2251 = vmatprep.subr.bf16.mxu1 %v3374_v44 }
  0x5f   :  { %2080 = vmatpush1.bf16.msra.mxu0 %v3369_v43 }
  0x60   :  { %2081 = vmatprep.subr.bf16.mxu0 %v3377_v45  ;;  %2252 = vmatpush1.bf16.msra.mxu1 %v3372_v46  ;;  %v98_v45 = vsub.s32 4, %v3926_v6 }
  0x61   :  { %2253 = vmatprep.subr.bf16.mxu1 %v3380_v48 }
  0x63   :  { %2082 = vmatpush1.bf16.msra.mxu0 %v3375_v47  ;;  %v3408_v47 = vld [vmem:[#allocation2 + $0x208] ss:$16 sps:$4 sm:$0xff]  }
  0x64   :  { %2083 = vmatprep.subr.bf16.mxu0 %v3383_v49  ;;  %2254 = vmatpush1.bf16.msra.mxu1 %v3378_v50  ;;  %v102_v50 = vsub.s32 5, %v3926_v6 }
  0x65   :  { %2255 = vmatprep.subr.bf16.mxu1 %v3386_v52  ;;  %v3416_v52 = vld [vmem:[#allocation2 + $0x22c] ss:$16 sps:$4 sm:$0xff]  }
  0x67   :  { %2084 = vmatpush1.bf16.msra.mxu0 %v3381_v51  ;;  %v3413_v51 = vld [vmem:[#allocation2 + $0x224] ss:$16 sps:$4 sm:$0xff]  }
  0x68   :  { %2256 = vmatpush1.bf16.msra.mxu1 %v3384_v53  ;;  %2085 = vmatprep.subr.bf16.mxu0 %v3389_v54 }
  0x69   :  { %2257 = vmatprep.subr.bf16.mxu1 %v3392_v55 }
  0x6b   :  { %2086 = vmatpush1.bf16.msra.mxu0 %v3387_v56  ;;  %v99_v56 = vrot.slane %v3932_v7, %v98_v45 }
  0x6c   :  { %2258 = vmatpush1.bf16.msra.mxu1 %v3390_v57  ;;  %2087 = vmatprep.subr.bf16.mxu0 %v3395_v58  ;;  %v3411_v57 = vld [vmem:[#allocation2 + $0x220] ss:$16 sps:$4 sm:$0xff]   ;;  %v3414_v58 = vld [vmem:[#allocation2 + $0x228] ss:$16 sps:$4 sm:$0xff]  }
  0x6d   :  { %2259 = vmatprep.subr.bf16.mxu1 %v3398_v59 }
  0x6f   :  { %2088 = vmatpush1.bf16.msra.mxu0 %v3393_v60  ;;  %v103_v60 = vrot.slane %v3932_v7, %v102_v50  ;;  %v3441_v50 = vld [vmem:[#allocation2 + $0x2c0] ss:$16 sps:$4 sm:$0xff]  }
  0x70   :  { %2260 = vmatpush1.bf16.msra.mxu1 %v3396_v61  ;;  %2089 = vmatprep.subr.bf16.mxu0 %v3401_v62  ;;  %v3419_v61 = vld [vmem:[#allocation2 + $0x244] ss:$16 sps:$4 sm:$0xff]   ;;  %v3422_v62 = vld [vmem:[#allocation2 + $0x24c] ss:$16 sps:$4 sm:$0xff]  }
  0x71   :  { %2261 = vmatprep.subr.bf16.mxu1 %v3404_v63 }
  0x73   :  { %2090 = vmatpush1.bf16.msra.mxu0 %v3399_v1  ;;  %v3417_v1 = vld [vmem:[#allocation2 + $0x240] ss:$16 sps:$4 sm:$0xff]  }
  0x74   :  { %2262 = vmatpush1.bf16.msra.mxu1 %v3402_v2  ;;  %2102 = vmatprep.subr.bf16.mxu0 %v3407_v3 }
  0x75   :  { %2274 = vmatprep.subr.bf16.mxu1 %v3410_v4  ;;  %v3420_v4 = vld [vmem:[#allocation2 + $0x248] ss:$16 sps:$4 sm:$0xff]  }
  0xf9   :  { %v323_v13 = vpop.f32.mrb[0].mxu0  ;;  %v366_v25 = vpop.f32.mrb[0].mxu1 }
  0xfa   :  { %v324_v14 = vadd.f32 %v323_v13, %v83_v9  ;;  %v325_v15 = vpop.f32.mrb[1].mxu0  ;;  %v367_v27 = vadd.f32 %v366_v25, %v91_v16  ;;  %v368_v28 = vpop.f32.mrb[1].mxu1  ;;  %v3428_v13 = vld [vmem:[#allocation2 + $0x26c] ss:$16 sps:$4 sm:$0xff]   ;;  %v3431_v25 = vld [vmem:[#allocation2 + $0x284] ss:$16 sps:$4 sm:$0xff]  }
  0xfb   :  { %v326_v17 = vadd.f32 %v325_v15, %v87_v11  ;;  %v327_v18 = vpop.f32.mrb[2].mxu0  ;;  %v369_v30 = vadd.f32 %v368_v28, %v95_v19  ;;  %v370_v31 = vpop.f32.mrb[2].mxu1 }
  0xfc   :  { %v461_v20 = vmul.f32 0.01, %v324_v14  ;;  %v328_v21 = vadd.f32 %v327_v18, %v83_v9  ;;  %v329_v22 = vpop.f32.mrb[3].mxu0  ;;  %v463_v34 = vmul.f32 0.01, %v367_v27  ;;  %v371_v35 = vadd.f32 %v370_v31, %v91_v16  ;;  %v372_v36 = vpop.f32.mrb[3].mxu1 }
  0xfd   :  { %v462_v23 = vmul.f32 0.01, %v326_v17  ;;  %v330_v24 = vadd.f32 %v329_v22, %v87_v11  ;;  %v464_v39 = vmul.f32 0.01, %v369_v30  ;;  %v373_v40 = vadd.f32 %v372_v36, %v95_v19  ;;  %v3426_v22 = vld [vmem:[#allocation2 + $0x268] ss:$16 sps:$4 sm:$0xff]  }
  0xfe   :  { %v469_v26 = vmul.f32 0.01, %v328_v21  ;;  %v477_v32 = vmax.f32 %v324_v14, %v461_v20  ;;  %v479_v43 = vmax.f32 %v367_v27, %v463_v34  ;;  %v471_v44 = vmul.f32 0.01, %v371_v35  ;;  %v3432_v31 = vld [vmem:[#allocation2 + $0x288] ss:$16 sps:$4 sm:$0xff]  }
  0xff   :  { %v470_v29 = vmul.f32 0.01, %v330_v24  ;;  %v478_v37 = vmax.f32 %v326_v17, %v462_v23  ;;  %v480_v48 = vmax.f32 %v369_v30, %v464_v39  ;;  %v472_v49 = vmul.f32 0.01, %v373_v40  ;;  %v3429_v30 = vld [vmem:[#allocation2 + $0x280] ss:$16 sps:$4 sm:$0xff]  }
 0x100   :  { %v485_v33 = vmax.f32 %v328_v21, %v469_v26  ;;  %v487_v53 = vmax.f32 %v371_v35, %v471_v44  ;;  %v3423_v21 = vld [vmem:[#allocation2 + $0x260] ss:$16 sps:$4 sm:$0xff]   ;;  %v3434_v26 = vld [vmem:[#allocation2 + $0x28c] ss:$16 sps:$4 sm:$0xff]   ;;  %v106_v35 = vsub.s32 6, %v3926_v6 }
 0x101   :  { %v486_v38 = vmax.f32 %v330_v24, %v470_v29  ;;  %v488_v54 = vmax.f32 %v373_v40, %v472_v49  ;;  %v3440_v34 = vld [vmem:[#allocation2 + $0x2ac] ss:$16 sps:$4 sm:$0xff]   ;;  %v3438_v39 = vld [vmem:[#allocation2 + $0x2a8] ss:$16 sps:$4 sm:$0xff]   ;;  %v110_v40 = vsub.s32 7, %v3926_v6 }
 0x102   :  { %v493_v41 = vpack.c.bf16 %v485_v33, %v477_v32  ;;  %v3951_v55 = vpack.c.bf16 %v487_v53, %v479_v43  ;;  %v3437_v33 = vld [vmem:[#allocation2 + $0x2a4] ss:$16 sps:$4 sm:$0xff]   ;;  %v3446_v43 = vld [vmem:[#allocation2 + $0x2cc] ss:$16 sps:$4 sm:$0xff]  }
 0x103   :  { %v494_v46 = vpack.c.bf16 %v486_v38, %v478_v37  ;;  %v496_v59 = vpack.c.bf16 %v488_v54, %v480_v48  ;;  %v107_v37 = vrot.slane %v3932_v7, %v106_v35  ;;  %v3435_v38 = vld [vmem:[#allocation2 + $0x2a0] ss:$16 sps:$4 sm:$0xff]   ;;  %v3491_v35 = vld [vmem:[#allocation2 + $0x3c4] ss:$16 sps:$4 sm:$0xff]  }
 0x105   :  { %2091 = vmatprep.mubr.bf16.mxu0 %v494_v46  ;;  %2263 = vmatprep.mubr.bf16.mxu1 %v494_v46  ;;  %v111_v46 = vrot.slane %v3932_v7, %v110_v40  ;;  %v3447_v7 = vld [vmem:[#allocation2 + $0x2e0] ss:$16 sps:$4 sm:$0xff]   ;;  %v3500_v40 = vld [vmem:[#allocation2 + $0x3ec] ss:$16 sps:$4 sm:$0xff]  }
 0x106   :  { %2092 = vmatmul.mubr.bf16.vlgmr.msra.gmra.mrb[8].mxu0 %v493_v41  ;;  %2264 = vmatmul.mubr.bf16.vlgmr.msra.gmra.mrb[8].mxu1 %v493_v41 }
 0x107   :  { %2103 = vmatpush1.bf16.msra.mxu0 %v3405_v42  ;;  %2275 = vmatpush1.bf16.msra.mxu1 %v3408_v47  ;;  %v3443_v42 = vld [vmem:[#allocation2 + $0x2c4] ss:$16 sps:$4 sm:$0xff]  }
 0x108   :  { %2104 = vmatprep.subr.bf16.mxu0 %v3413_v51  ;;  %2276 = vmatprep.subr.bf16.mxu1 %v3416_v52  ;;  %v3444_v51 = vld [vmem:[#allocation2 + $0x2c8] ss:$16 sps:$4 sm:$0xff]  }
 0x109   :  { %2134 = vmatprep.mubr.bf16.mxu0 %v496_v59  ;;  %2306 = vmatprep.mubr.bf16.mxu1 %v496_v59  ;;  %v409_v63 = vpop.f32.mrb[4].mxu0 }
 0x10a   :  { %v410_v2 = vadd.f32 %v409_v63, %v99_v56  ;;  %v411_v3 = vpop.f32.mrb[5].mxu0  ;;  %v452_v36 = vpop.f32.mrb[4].mxu1 }
 0x10b   :  { %2105 = vmatpush1.bf16.msra.mxu0 %v3411_v57  ;;  %2277 = vmatpush1.bf16.msra.mxu1 %v3414_v58  ;;  %v412_v9 = vadd.f32 %v411_v3, %v103_v60  ;;  %v413_v11 = vpop.f32.mrb[6].mxu0  ;;  %v454_v41 = vpop.f32.mrb[5].mxu1  ;;  %v453_v44 = vadd.f32 %v452_v36, %v107_v37  ;;  %v3452_v57 = vld [vmem:[#allocation2 + $0x2ec] ss:$16 sps:$4 sm:$0xff]   ;;  %v3455_v3 = vld [vmem:[#allocation2 + $0x304] ss:$16 sps:$4 sm:$0xff]  }
 0x10c   :  { %2106 = vmatprep.subr.bf16.mxu0 %v3419_v61  ;;  %2278 = vmatprep.subr.bf16.mxu1 %v3422_v62  ;;  %v465_v14 = vmul.f32 0.01, %v410_v2  ;;  %v414_v15 = vadd.f32 %v413_v11, %v99_v56  ;;  %v415_v16 = vpop.f32.mrb[7].mxu0  ;;  %v456_v45 = vpop.f32.mrb[6].mxu1  ;;  %v455_v52 = vadd.f32 %v454_v41, %v111_v46  ;;  %v3449_v56 = vld [vmem:[#allocation2 + $0x2e4] ss:$16 sps:$4 sm:$0xff]  }
 0x10d   :  { %v466_v17 = vmul.f32 0.01, %v412_v9  ;;  %v416_v18 = vadd.f32 %v415_v16, %v103_v60  ;;  %v457_v47 = vadd.f32 %v456_v45, %v107_v37  ;;  %v458_v48 = vpop.f32.mrb[7].mxu1  ;;  %v467_v49 = vmul.f32 0.01, %v453_v44 }
 0x10e   :  { %v481_v19 = vmax.f32 %v410_v2, %v465_v14  ;;  %v473_v20 = vmul.f32 0.01, %v414_v15  ;;  %v459_v54 = vadd.f32 %v458_v48, %v111_v46  ;;  %v468_v59 = vmul.f32 0.01, %v455_v52  ;;  %v3450_v62 = vld [vmem:[#allocation2 + $0x2e8] ss:$16 sps:$4 sm:$0xff]  }
 0x10f   :  { %2107 = vmatpush1.bf16.msra.mxu0 %v3417_v1  ;;  %2279 = vmatpush1.bf16.msra.mxu1 %v3420_v4  ;;  %v482_v23 = vmax.f32 %v412_v9, %v466_v17  ;;  %v474_v24 = vmul.f32 0.01, %v416_v18  ;;  %v475_v53 = vmul.f32 0.01, %v457_v47  ;;  %v483_v58 = vmax.f32 %v453_v44, %v467_v49  ;;  %v3458_v4 = vld [vmem:[#allocation2 + $0x30c] ss:$16 sps:$4 sm:$0xff]  }
 0x110   :  { %2108 = vmatprep.subr.bf16.mxu0 %v3425_v5  ;;  %2280 = vmatprep.subr.bf16.mxu1 %v3428_v13  ;;  %v489_v27 = vmax.f32 %v414_v15, %v473_v20  ;;  %v476_v61 = vmul.f32 0.01, %v459_v54  ;;  %v484_v63 = vmax.f32 %v455_v52, %v468_v59  ;;  %v3453_v9 = vld [vmem:[#allocation2 + $0x300] ss:$16 sps:$4 sm:$0xff]   ;;  %v3456_v11 = vld [vmem:[#allocation2 + $0x308] ss:$16 sps:$4 sm:$0xff]  }
 0x111   :  { %v490_v28 = vmax.f32 %v416_v18, %v474_v24  ;;  %v491_v60 = vmax.f32 %v457_v47, %v475_v53  ;;  %v3461_v13 = vld [vmem:[#allocation2 + $0x324] ss:$16 sps:$4 sm:$0xff]   ;;  %v3464_v14 = vld [vmem:[#allocation2 + $0x32c] ss:$16 sps:$4 sm:$0xff]   ;;  %v3459_v15 = vld [vmem:[#allocation2 + $0x320] ss:$16 sps:$4 sm:$0xff]  }
 0x112   :  { %v3955_v29 = vpack.c.bf16 %v489_v27, %v481_v19  ;;  %v492_v2 = vmax.f32 %v459_v54, %v476_v61  ;;  %v3462_v16 = vld [vmem:[#allocation2 + $0x328] ss:$16 sps:$4 sm:$0xff]   ;;  %v3467_v17 = vld [vmem:[#allocation2 + $0x344] ss:$16 sps:$4 sm:$0xff]   ;;  %v3470_v18 = vld [vmem:[#allocation2 + $0x34c] ss:$16 sps:$4 sm:$0xff]  }
 0x113   :  { %2109 = vmatpush1.bf16.msra.mxu0 %v3423_v21  ;;  %2281 = vmatpush1.bf16.msra.mxu1 %v3426_v22  ;;  %v3957_v32 = vpack.c.bf16 %v490_v28, %v482_v23  ;;  %v3963_v1 = vpack.c.bf16 %v491_v60, %v483_v58  ;;  %v3465_v19 = vld [vmem:[#allocation2 + $0x340] ss:$16 sps:$4 sm:$0xff]   ;;  %v3468_v20 = vld [vmem:[#allocation2 + $0x348] ss:$16 sps:$4 sm:$0xff]   ;;  %v3473_v21 = vld [vmem:[#allocation2 + $0x364] ss:$16 sps:$4 sm:$0xff]  }
 0x114   :  { %2110 = vmatprep.subr.bf16.mxu0 %v3431_v25  ;;  %2282 = vmatprep.subr.bf16.mxu1 %v3434_v26  ;;  %v3965_v5 = vpack.c.bf16 %v492_v2, %v484_v63  ;;  %v3476_v22 = vld [vmem:[#allocation2 + $0x36c] ss:$16 sps:$4 sm:$0xff]   ;;  %v3471_v23 = vld [vmem:[#allocation2 + $0x360] ss:$16 sps:$4 sm:$0xff]   ;;  %v3474_v24 = vld [vmem:[#allocation2 + $0x368] ss:$16 sps:$4 sm:$0xff]  }
 0x115   :  { %v3479_v25 = vld [vmem:[#allocation2 + $0x384] ss:$16 sps:$4 sm:$0xff]   ;;  %v3482_v26 = vld [vmem:[#allocation2 + $0x38c] ss:$16 sps:$4 sm:$0xff]   ;;  %v3477_v27 = vld [vmem:[#allocation2 + $0x380] ss:$16 sps:$4 sm:$0xff]  }
 0x116   :  { %v3480_v28 = vld [vmem:[#allocation2 + $0x388] ss:$16 sps:$4 sm:$0xff]   ;;  %v3494_v36 = vld [vmem:[#allocation2 + $0x3cc] ss:$16 sps:$4 sm:$0xff]   ;;  %v3489_v37 = vld [vmem:[#allocation2 + $0x3c0] ss:$16 sps:$4 sm:$0xff]  }
 0x117   :  { %2111 = vmatpush1.bf16.msra.mxu0 %v3429_v30  ;;  %2283 = vmatpush1.bf16.msra.mxu1 %v3432_v31  ;;  %v3485_v30 = vld [vmem:[#allocation2 + $0x3a4] ss:$16 sps:$4 sm:$0xff]   ;;  %v3488_v31 = vld [vmem:[#allocation2 + $0x3ac] ss:$16 sps:$4 sm:$0xff]   ;;  %v3495_v41 = vld [vmem:[#allocation2 + $0x3e0] ss:$16 sps:$4 sm:$0xff]  }
 0x118   :  { %2112 = vmatprep.subr.bf16.mxu0 %v3437_v33  ;;  %2284 = vmatprep.subr.bf16.mxu1 %v3440_v34  ;;  %v3483_v33 = vld [vmem:[#allocation2 + $0x3a0] ss:$16 sps:$4 sm:$0xff]   ;;  %v3486_v34 = vld [vmem:[#allocation2 + $0x3a8] ss:$16 sps:$4 sm:$0xff]   ;;  %v3506_v44 = vld [vmem:[#allocation2 + $0x40c] ss:$16 sps:$4 sm:$0xff]  }
 0x119   :  { %v3501_v45 = vld [vmem:[#allocation2 + $0x400] ss:$16 sps:$4 sm:$0xff]   ;;  %v3504_v46 = vld [vmem:[#allocation2 + $0x408] ss:$16 sps:$4 sm:$0xff]   ;;  %v3509_v47 = vld [vmem:[#allocation2 + $0x424] ss:$16 sps:$4 sm:$0xff]  }
 0x11a   :  { %v3512_v48 = vld [vmem:[#allocation2 + $0x42c] ss:$16 sps:$4 sm:$0xff]   ;;  %v3507_v49 = vld [vmem:[#allocation2 + $0x420] ss:$16 sps:$4 sm:$0xff]   ;;  %v3516_v54 = vld [vmem:[#allocation2 + $0x448] ss:$16 sps:$4 sm:$0xff]  }
 0x11b   :  { %2113 = vmatpush1.bf16.msra.mxu0 %v3435_v38  ;;  %2285 = vmatpush1.bf16.msra.mxu1 %v3438_v39  ;;  %v3492_v38 = vld [vmem:[#allocation2 + $0x3c8] ss:$16 sps:$4 sm:$0xff]   ;;  %v3497_v39 = vld [vmem:[#allocation2 + $0x3e4] ss:$16 sps:$4 sm:$0xff]   ;;  %v3518_v52 = vld [vmem:[#allocation2 + $0x44c] ss:$16 sps:$4 sm:$0xff]  }
 0x11c   :  { %2114 = vmatprep.subr.bf16.mxu0 %v3443_v42  ;;  %2286 = vmatprep.subr.bf16.mxu1 %v3446_v43  ;;  %v3498_v42 = vld [vmem:[#allocation2 + $0x3e8] ss:$16 sps:$4 sm:$0xff]   ;;  %v3503_v43 = vld [vmem:[#allocation2 + $0x404] ss:$16 sps:$4 sm:$0xff]   ;;  %v3513_v53 = vld [vmem:[#allocation2 + $0x440] ss:$16 sps:$4 sm:$0xff]  }
 0x11d   :  { %v3522_v58 = vld [vmem:[#allocation2 + $0x468] ss:$16 sps:$4 sm:$0xff]   ;;  %v3527_v59 = vld [vmem:[#allocation2 + $0x484] ss:$16 sps:$4 sm:$0xff]   ;;  %v3530_v60 = vld [vmem:[#allocation2 + $0x48c] ss:$16 sps:$4 sm:$0xff]  }
 0x11e   :  { %v3525_v61 = vld [vmem:[#allocation2 + $0x480] ss:$16 sps:$4 sm:$0xff]   ;;  %v3534_v2 = vld [vmem:[#allocation2 + $0x4a8] ss:$16 sps:$4 sm:$0xff]  }
 0x11f   :  { %2115 = vmatpush1.bf16.msra.mxu0 %v3441_v50  ;;  %2287 = vmatpush1.bf16.msra.mxu1 %v3444_v51  ;;  %v3510_v50 = vld [vmem:[#allocation2 + $0x428] ss:$16 sps:$4 sm:$0xff]   ;;  %v3515_v51 = vld [vmem:[#allocation2 + $0x444] ss:$16 sps:$4 sm:$0xff]   ;;  %v3531_v63 = vld [vmem:[#allocation2 + $0x4a0] ss:$16 sps:$4 sm:$0xff]  }
 0x120   :  { %2116 = vmatprep.subr.bf16.mxu0 %v3449_v56  ;;  %2288 = vmatprep.subr.bf16.mxu1 %v3452_v57  ;;  %v3521_v56 = vld [vmem:[#allocation2 + $0x464] ss:$16 sps:$4 sm:$0xff]   ;;  %v3519_v57 = vld [vmem:[#allocation2 + $0x460] ss:$16 sps:$4 sm:$0xff]  }
 0x123   :  { %2117 = vmatpush1.bf16.msra.mxu0 %v3447_v7  ;;  %2289 = vmatpush1.bf16.msra.mxu1 %v3450_v62  ;;  %v3533_v7 = vld [vmem:[#allocation2 + $0x4a4] ss:$16 sps:$4 sm:$0xff]   ;;  %v3536_v62 = vld [vmem:[#allocation2 + $0x4ac] ss:$16 sps:$4 sm:$0xff]  }
 0x124   :  { %2118 = vmatprep.subr.bf16.mxu0 %v3455_v3  ;;  %2290 = vmatprep.subr.bf16.mxu1 %v3458_v4  ;;  %v3539_v3 = vld [vmem:[#allocation2 + $0x4c4] ss:$16 sps:$4 sm:$0xff]   ;;  %v3542_v4 = vld [vmem:[#allocation2 + $0x4cc] ss:$16 sps:$4 sm:$0xff]  }
 0x127   :  { %2119 = vmatpush1.bf16.msra.mxu0 %v3453_v9  ;;  %2291 = vmatpush1.bf16.msra.mxu1 %v3456_v11  ;;  %v3537_v9 = vld [vmem:[#allocation2 + $0x4c0] ss:$16 sps:$4 sm:$0xff]   ;;  %v3540_v11 = vld [vmem:[#allocation2 + $0x4c8] ss:$16 sps:$4 sm:$0xff]  }
 0x128   :  { %2120 = vmatprep.subr.bf16.mxu0 %v3461_v13  ;;  %2292 = vmatprep.subr.bf16.mxu1 %v3464_v14  ;;  %v3545_v13 = vld [vmem:[#allocation2 + $0x4e4] ss:$16 sps:$4 sm:$0xff]   ;;  %v3548_v14 = vld [vmem:[#allocation2 + $0x4ec] ss:$16 sps:$4 sm:$0xff]  }
 0x12b   :  { %2121 = vmatpush1.bf16.msra.mxu0 %v3459_v15  ;;  %2293 = vmatpush1.bf16.msra.mxu1 %v3462_v16  ;;  %v3543_v15 = vld [vmem:[#allocation2 + $0x4e0] ss:$16 sps:$4 sm:$0xff]   ;;  %v3546_v16 = vld [vmem:[#allocation2 + $0x4e8] ss:$16 sps:$4 sm:$0xff]  }
 0x12c   :  { %2122 = vmatprep.subr.bf16.mxu0 %v3467_v17  ;;  %2294 = vmatprep.subr.bf16.mxu1 %v3470_v18  ;;  %v3551_v17 = vld [vmem:[#allocation2 + $0x504] ss:$16 sps:$4 sm:$0xff]   ;;  %v3554_v18 = vld [vmem:[#allocation2 + $0x50c] ss:$16 sps:$4 sm:$0xff]  }
 0x12f   :  { %2123 = vmatpush1.bf16.msra.mxu0 %v3465_v19  ;;  %2295 = vmatpush1.bf16.msra.mxu1 %v3468_v20  ;;  %v3549_v19 = vld [vmem:[#allocation2 + $0x500] ss:$16 sps:$4 sm:$0xff]   ;;  %v3552_v20 = vld [vmem:[#allocation2 + $0x508] ss:$16 sps:$4 sm:$0xff]  }
 0x130   :  { %2124 = vmatprep.subr.bf16.mxu0 %v3473_v21  ;;  %2296 = vmatprep.subr.bf16.mxu1 %v3476_v22  ;;  %v3557_v21 = vld [vmem:[#allocation2 + $0x524] ss:$16 sps:$4 sm:$0xff]   ;;  %v3560_v22 = vld [vmem:[#allocation2 + $0x52c] ss:$16 sps:$4 sm:$0xff]  }
 0x133   :  { %2125 = vmatpush1.bf16.msra.mxu0 %v3471_v23  ;;  %2297 = vmatpush1.bf16.msra.mxu1 %v3474_v24  ;;  %v3555_v23 = vld [vmem:[#allocation2 + $0x520] ss:$16 sps:$4 sm:$0xff]   ;;  %v3558_v24 = vld [vmem:[#allocation2 + $0x528] ss:$16 sps:$4 sm:$0xff]  }
 0x134   :  { %2126 = vmatprep.subr.bf16.mxu0 %v3479_v25  ;;  %2298 = vmatprep.subr.bf16.mxu1 %v3482_v26  ;;  %v3563_v25 = vld [vmem:[#allocation2 + $0x544] ss:$16 sps:$4 sm:$0xff]   ;;  %v3566_v26 = vld [vmem:[#allocation2 + $0x54c] ss:$16 sps:$4 sm:$0xff]  }
 0x137   :  { %2127 = vmatpush1.bf16.msra.mxu0 %v3477_v27  ;;  %2299 = vmatpush1.bf16.msra.mxu1 %v3480_v28  ;;  %v3561_v27 = vld [vmem:[#allocation2 + $0x540] ss:$16 sps:$4 sm:$0xff]   ;;  %v3564_v28 = vld [vmem:[#allocation2 + $0x548] ss:$16 sps:$4 sm:$0xff]  }
 0x138   :  { %2128 = vmatprep.subr.bf16.mxu0 %v3485_v30  ;;  %2300 = vmatprep.subr.bf16.mxu1 %v3488_v31  ;;  %v3569_v30 = vld [vmem:[#allocation2 + $0x564] ss:$16 sps:$4 sm:$0xff]   ;;  %v3572_v31 = vld [vmem:[#allocation2 + $0x56c] ss:$16 sps:$4 sm:$0xff]  }
 0x13b   :  { %2129 = vmatpush1.bf16.msra.mxu0 %v3483_v33  ;;  %2301 = vmatpush1.bf16.msra.mxu1 %v3486_v34  ;;  %v3567_v33 = vld [vmem:[#allocation2 + $0x560] ss:$16 sps:$4 sm:$0xff]   ;;  %v3570_v34 = vld [vmem:[#allocation2 + $0x568] ss:$16 sps:$4 sm:$0xff]  }
 0x13c   :  { %2130 = vmatprep.subr.bf16.mxu0 %v3491_v35  ;;  %2302 = vmatprep.subr.bf16.mxu1 %v3494_v36  ;;  %v3575_v35 = vld [vmem:[#allocation2 + $0x584] ss:$16 sps:$4 sm:$0xff]   ;;  %v3578_v36 = vld [vmem:[#allocation2 + $0x58c] ss:$16 sps:$4 sm:$0xff]  }
 0x13f   :  { %2131 = vmatpush1.bf16.msra.mxu0 %v3489_v37  ;;  %2303 = vmatpush1.bf16.msra.mxu1 %v3492_v38  ;;  %v3573_v37 = vld [vmem:[#allocation2 + $0x580] ss:$16 sps:$4 sm:$0xff]   ;;  %v3576_v38 = vld [vmem:[#allocation2 + $0x588] ss:$16 sps:$4 sm:$0xff]  }
 0x140   :  { %2132 = vmatprep.subr.bf16.mxu0 %v3497_v39  ;;  %2304 = vmatprep.subr.bf16.mxu1 %v3500_v40  ;;  %v3581_v39 = vld [vmem:[#allocation2 + $0x5a4] ss:$16 sps:$4 sm:$0xff]   ;;  %v3584_v40 = vld [vmem:[#allocation2 + $0x5ac] ss:$16 sps:$4 sm:$0xff]  }
 0x143   :  { %2133 = vmatpush1.bf16.msra.mxu0 %v3495_v41  ;;  %2305 = vmatpush1.bf16.msra.mxu1 %v3498_v42  ;;  %v3579_v41 = vld [vmem:[#allocation2 + $0x5a0] ss:$16 sps:$4 sm:$0xff]   ;;  %v3582_v42 = vld [vmem:[#allocation2 + $0x5a8] ss:$16 sps:$4 sm:$0xff]  }
 0x144   :  { %2145 = vmatprep.subr.bf16.mxu0 %v3503_v43  ;;  %2317 = vmatprep.subr.bf16.mxu1 %v3506_v44  ;;  %v3587_v43 = vld [vmem:[#allocation2 + $0x5c4] ss:$16 sps:$4 sm:$0xff]   ;;  %v3590_v44 = vld [vmem:[#allocation2 + $0x5cc] ss:$16 sps:$4 sm:$0xff]  }
 0x146   :  { %2135 = vmatmul.mubr.bf16.vlgmr.msra.gmra.mrb[8].mxu0 %v3951_v55  ;;  %2307 = vmatmul.mubr.bf16.vlgmr.msra.gmra.mrb[8].mxu1 %v3951_v55  ;;  %v3524_v55 = vld [vmem:[#allocation2 + $0x46c] ss:$16 sps:$4 sm:$0xff]  }
 0x147   :  { %2146 = vmatpush1.bf16.msra.mxu0 %v3501_v45  ;;  %2318 = vmatpush1.bf16.msra.mxu1 %v3504_v46  ;;  %v3585_v45 = vld [vmem:[#allocation2 + $0x5c0] ss:$16 sps:$4 sm:$0xff]   ;;  %v3588_v46 = vld [vmem:[#allocation2 + $0x5c8] ss:$16 sps:$4 sm:$0xff]  }
 0x148   :  { %2147 = vmatprep.subr.bf16.mxu0 %v3509_v47  ;;  %2319 = vmatprep.subr.bf16.mxu1 %v3512_v48  ;;  %v3593_v47 = vld [vmem:[#allocation2 + $0x5e4] ss:$16 sps:$4 sm:$0xff]   ;;  %v3596_v48 = vld [vmem:[#allocation2 + $0x5ec] ss:$16 sps:$4 sm:$0xff]  }
 0x149   :  { %2177 = vmatprep.mubr.bf16.mxu0 %v3957_v32  ;;  %2349 = vmatprep.mubr.bf16.mxu1 %v3957_v32  ;;  %v3528_v32 = vld [vmem:[#allocation2 + $0x488] ss:$16 sps:$4 sm:$0xff]  }
 0x14b   :  { %2148 = vmatpush1.bf16.msra.mxu0 %v3507_v49  ;;  %2320 = vmatpush1.bf16.msra.mxu1 %v3510_v50  ;;  %v3591_v49 = vld [vmem:[#allocation2 + $0x5e0] ss:$16 sps:$4 sm:$0xff]   ;;  %v3594_v50 = vld [vmem:[#allocation2 + $0x5e8] ss:$16 sps:$4 sm:$0xff]  }
 0x14c   :  { %2149 = vmatprep.subr.bf16.mxu0 %v3515_v51  ;;  %2321 = vmatprep.subr.bf16.mxu1 %v3518_v52  ;;  %v3599_v51 = vld [vmem:[#allocation2 + $0x604] ss:$16 sps:$4 sm:$0xff]   ;;  %v3602_v52 = vld [vmem:[#allocation2 + $0x60c] ss:$16 sps:$4 sm:$0xff]  }
 0x14f   :  { %2150 = vmatpush1.bf16.msra.mxu0 %v3513_v53  ;;  %2322 = vmatpush1.bf16.msra.mxu1 %v3516_v54  ;;  %v3597_v53 = vld [vmem:[#allocation2 + $0x600] ss:$16 sps:$4 sm:$0xff]   ;;  %v3600_v54 = vld [vmem:[#allocation2 + $0x608] ss:$16 sps:$4 sm:$0xff]  }
 0x150   :  { %2151 = vmatprep.subr.bf16.mxu0 %v3521_v56  ;;  %2323 = vmatprep.subr.bf16.mxu1 %v3524_v55  ;;  %v3605_v56 = vld [vmem:[#allocation2 + $0x624] ss:$16 sps:$4 sm:$0xff]   ;;  %v3608_v55 = vld [vmem:[#allocation2 + $0x62c] ss:$16 sps:$4 sm:$0xff]  }
 0x153   :  { %2152 = vmatpush1.bf16.msra.mxu0 %v3519_v57  ;;  %2324 = vmatpush1.bf16.msra.mxu1 %v3522_v58  ;;  %v3603_v57 = vld [vmem:[#allocation2 + $0x620] ss:$16 sps:$4 sm:$0xff]   ;;  %v3606_v58 = vld [vmem:[#allocation2 + $0x628] ss:$16 sps:$4 sm:$0xff]  }
 0x154   :  { %2153 = vmatprep.subr.bf16.mxu0 %v3527_v59  ;;  %2325 = vmatprep.subr.bf16.mxu1 %v3530_v60  ;;  %v3611_v59 = vld [vmem:[#allocation2 + $0x644] ss:$16 sps:$4 sm:$0xff]   ;;  %v3614_v60 = vld [vmem:[#allocation2 + $0x64c] ss:$16 sps:$4 sm:$0xff]  }
 0x157   :  { %2154 = vmatpush1.bf16.msra.mxu0 %v3525_v61  ;;  %2326 = vmatpush1.bf16.msra.mxu1 %v3528_v32  ;;  %v3609_v61 = vld [vmem:[#allocation2 + $0x640] ss:$16 sps:$4 sm:$0xff]   ;;  %v3612_v32 = vld [vmem:[#allocation2 + $0x648] ss:$16 sps:$4 sm:$0xff]  }
 0x158   :  { %2155 = vmatprep.subr.bf16.mxu0 %v3533_v7  ;;  %2327 = vmatprep.subr.bf16.mxu1 %v3536_v62  ;;  %v3617_v7 = vld [vmem:[#allocation2 + $0x664] ss:$16 sps:$4 sm:$0xff]   ;;  %v3615_v62 = vld [vmem:[#allocation2 + $0x660] ss:$16 sps:$4 sm:$0xff]  }
 0x15b   :  { %2156 = vmatpush1.bf16.msra.mxu0 %v3531_v63  ;;  %2328 = vmatpush1.bf16.msra.mxu1 %v3534_v2  ;;  %v3618_v63 = vld [vmem:[#allocation2 + $0x668] ss:$16 sps:$4 sm:$0xff]   ;;  %v3623_v2 = vld [vmem:[#allocation2 + $0x684] ss:$16 sps:$4 sm:$0xff]  }
 0x15c   :  { %2157 = vmatprep.subr.bf16.mxu0 %v3539_v3  ;;  %2329 = vmatprep.subr.bf16.mxu1 %v3542_v4  ;;  %v3626_v3 = vld [vmem:[#allocation2 + $0x68c] ss:$16 sps:$4 sm:$0xff]   ;;  %v3621_v4 = vld [vmem:[#allocation2 + $0x680] ss:$16 sps:$4 sm:$0xff]  }
 0x15f   :  { %2158 = vmatpush1.bf16.msra.mxu0 %v3537_v9  ;;  %2330 = vmatpush1.bf16.msra.mxu1 %v3540_v11  ;;  %v3629_v9 = vld [vmem:[#allocation2 + $0x6a4] ss:$16 sps:$4 sm:$0xff]   ;;  %v3632_v11 = vld [vmem:[#allocation2 + $0x6ac] ss:$16 sps:$4 sm:$0xff]  }
 0x160   :  { %2159 = vmatprep.subr.bf16.mxu0 %v3545_v13  ;;  %2331 = vmatprep.subr.bf16.mxu1 %v3548_v14  ;;  %v3627_v13 = vld [vmem:[#allocation2 + $0x6a0] ss:$16 sps:$4 sm:$0xff]   ;;  %v3630_v14 = vld [vmem:[#allocation2 + $0x6a8] ss:$16 sps:$4 sm:$0xff]  }
 0x163   :  { %2160 = vmatpush1.bf16.msra.mxu0 %v3543_v15  ;;  %2332 = vmatpush1.bf16.msra.mxu1 %v3546_v16  ;;  %v3635_v15 = vld [vmem:[#allocation2 + $0x6c4] ss:$16 sps:$4 sm:$0xff]   ;;  %v3638_v16 = vld [vmem:[#allocation2 + $0x6cc] ss:$16 sps:$4 sm:$0xff]  }
 0x164   :  { %2161 = vmatprep.subr.bf16.mxu0 %v3551_v17  ;;  %2333 = vmatprep.subr.bf16.mxu1 %v3554_v18  ;;  %v3633_v17 = vld [vmem:[#allocation2 + $0x6c0] ss:$16 sps:$4 sm:$0xff]   ;;  %v3636_v18 = vld [vmem:[#allocation2 + $0x6c8] ss:$16 sps:$4 sm:$0xff]  }
 0x167   :  { %2162 = vmatpush1.bf16.msra.mxu0 %v3549_v19  ;;  %2334 = vmatpush1.bf16.msra.mxu1 %v3552_v20  ;;  %v3641_v19 = vld [vmem:[#allocation2 + $0x6e4] ss:$16 sps:$4 sm:$0xff]   ;;  %v3644_v20 = vld [vmem:[#allocation2 + $0x6ec] ss:$16 sps:$4 sm:$0xff]  }
 0x168   :  { %2163 = vmatprep.subr.bf16.mxu0 %v3557_v21  ;;  %2335 = vmatprep.subr.bf16.mxu1 %v3560_v22  ;;  %v3639_v21 = vld [vmem:[#allocation2 + $0x6e0] ss:$16 sps:$4 sm:$0xff]   ;;  %v3642_v22 = vld [vmem:[#allocation2 + $0x6e8] ss:$16 sps:$4 sm:$0xff]  }
 0x16b   :  { %2164 = vmatpush1.bf16.msra.mxu0 %v3555_v23  ;;  %2336 = vmatpush1.bf16.msra.mxu1 %v3558_v24  ;;  %v3647_v23 = vld [vmem:[#allocation2 + $0x704] ss:$16 sps:$4 sm:$0xff]   ;;  %v3650_v24 = vld [vmem:[#allocation2 + $0x70c] ss:$16 sps:$4 sm:$0xff]  }
 0x16c   :  { %2165 = vmatprep.subr.bf16.mxu0 %v3563_v25  ;;  %2337 = vmatprep.subr.bf16.mxu1 %v3566_v26  ;;  %v3645_v25 = vld [vmem:[#allocation2 + $0x700] ss:$16 sps:$4 sm:$0xff]   ;;  %v3648_v26 = vld [vmem:[#allocation2 + $0x708] ss:$16 sps:$4 sm:$0xff]  }
 0x16f   :  { %2166 = vmatpush1.bf16.msra.mxu0 %v3561_v27  ;;  %2338 = vmatpush1.bf16.msra.mxu1 %v3564_v28  ;;  %v3653_v27 = vld [vmem:[#allocation2 + $0x724] ss:$16 sps:$4 sm:$0xff]   ;;  %v3656_v28 = vld [vmem:[#allocation2 + $0x72c] ss:$16 sps:$4 sm:$0xff]  }
 0x170   :  { %2167 = vmatprep.subr.bf16.mxu0 %v3569_v30  ;;  %2339 = vmatprep.subr.bf16.mxu1 %v3572_v31  ;;  %v3651_v30 = vld [vmem:[#allocation2 + $0x720] ss:$16 sps:$4 sm:$0xff]   ;;  %v3654_v31 = vld [vmem:[#allocation2 + $0x728] ss:$16 sps:$4 sm:$0xff]  }
 0x173   :  { %2168 = vmatpush1.bf16.msra.mxu0 %v3567_v33  ;;  %2340 = vmatpush1.bf16.msra.mxu1 %v3570_v34  ;;  %v3659_v33 = vld [vmem:[#allocation2 + $0x744] ss:$16 sps:$4 sm:$0xff]   ;;  %v3662_v34 = vld [vmem:[#allocation2 + $0x74c] ss:$16 sps:$4 sm:$0xff]  }
 0x174   :  { %2169 = vmatprep.subr.bf16.mxu0 %v3575_v35  ;;  %2341 = vmatprep.subr.bf16.mxu1 %v3578_v36  ;;  %v3657_v35 = vld [vmem:[#allocation2 + $0x740] ss:$16 sps:$4 sm:$0xff]   ;;  %v3660_v36 = vld [vmem:[#allocation2 + $0x748] ss:$16 sps:$4 sm:$0xff]  }
 0x177   :  { %2170 = vmatpush1.bf16.msra.mxu0 %v3573_v37  ;;  %2342 = vmatpush1.bf16.msra.mxu1 %v3576_v38  ;;  %v3665_v37 = vld [vmem:[#allocation2 + $0x764] ss:$16 sps:$4 sm:$0xff]   ;;  %v3668_v38 = vld [vmem:[#allocation2 + $0x76c] ss:$16 sps:$4 sm:$0xff]  }
 0x178   :  { %2171 = vmatprep.subr.bf16.mxu0 %v3581_v39  ;;  %2343 = vmatprep.subr.bf16.mxu1 %v3584_v40  ;;  %v3663_v39 = vld [vmem:[#allocation2 + $0x760] ss:$16 sps:$4 sm:$0xff]   ;;  %v3666_v40 = vld [vmem:[#allocation2 + $0x768] ss:$16 sps:$4 sm:$0xff]  }
 0x17b   :  { %2172 = vmatpush1.bf16.msra.mxu0 %v3579_v41  ;;  %2344 = vmatpush1.bf16.msra.mxu1 %v3582_v42  ;;  %v3671_v41 = vld [vmem:[#allocation2 + $0x784] ss:$16 sps:$4 sm:$0xff]   ;;  %v3674_v42 = vld [vmem:[#allocation2 + $0x78c] ss:$16 sps:$4 sm:$0xff]  }
 0x17c   :  { %2173 = vmatprep.subr.bf16.mxu0 %v3587_v43  ;;  %2345 = vmatprep.subr.bf16.mxu1 %v3590_v44  ;;  %v3669_v43 = vld [vmem:[#allocation2 + $0x780] ss:$16 sps:$4 sm:$0xff]   ;;  %v3672_v44 = vld [vmem:[#allocation2 + $0x788] ss:$16 sps:$4 sm:$0xff]  }
 0x17f   :  { %2174 = vmatpush1.bf16.msra.mxu0 %v3585_v45  ;;  %2346 = vmatpush1.bf16.msra.mxu1 %v3588_v46  ;;  %v3677_v45 = vld [vmem:[#allocation2 + $0x7a4] ss:$16 sps:$4 sm:$0xff]   ;;  %v3680_v46 = vld [vmem:[#allocation2 + $0x7ac] ss:$16 sps:$4 sm:$0xff]  }
 0x180   :  { %2175 = vmatprep.subr.bf16.mxu0 %v3593_v47  ;;  %2347 = vmatprep.subr.bf16.mxu1 %v3596_v48  ;;  %v3675_v47 = vld [vmem:[#allocation2 + $0x7a0] ss:$16 sps:$4 sm:$0xff]   ;;  %v3678_v48 = vld [vmem:[#allocation2 + $0x7a8] ss:$16 sps:$4 sm:$0xff]  }
 0x183   :  { %2176 = vmatpush1.bf16.msra.mxu0 %v3591_v49  ;;  %2348 = vmatpush1.bf16.msra.mxu1 %v3594_v50  ;;  %v3683_v49 = vld [vmem:[#allocation2 + $0x7c4] ss:$16 sps:$4 sm:$0xff]   ;;  %v3686_v50 = vld [vmem:[#allocation2 + $0x7cc] ss:$16 sps:$4 sm:$0xff]  }
 0x184   :  { %2188 = vmatprep.subr.bf16.mxu0 %v3599_v51  ;;  %2360 = vmatprep.subr.bf16.mxu1 %v3602_v52  ;;  %v3681_v51 = vld [vmem:[#allocation2 + $0x7c0] ss:$16 sps:$4 sm:$0xff]   ;;  %v3684_v52 = vld [vmem:[#allocation2 + $0x7c8] ss:$16 sps:$4 sm:$0xff]  }
 0x186   :  { %2178 = vmatmul.mubr.bf16.vlgmr.msra.gmra.mrb[8].mxu0 %v3955_v29  ;;  %2350 = vmatmul.mubr.bf16.vlgmr.msra.gmra.mrb[8].mxu1 %v3955_v29  ;;  %v3620_v29 = vld [vmem:[#allocation2 + $0x66c] ss:$16 sps:$4 sm:$0xff]  }
 0x187   :  { %2189 = vmatpush1.bf16.msra.mxu0 %v3597_v53  ;;  %2361 = vmatpush1.bf16.msra.mxu1 %v3600_v54  ;;  %v3689_v53 = vld [vmem:[#allocation2 + $0x7e4] ss:$16 sps:$4 sm:$0xff]   ;;  %v3692_v54 = vld [vmem:[#allocation2 + $0x7ec] ss:$16 sps:$4 sm:$0xff]  }
 0x188   :  { %2190 = vmatprep.subr.bf16.mxu0 %v3605_v56  ;;  %2362 = vmatprep.subr.bf16.mxu1 %v3608_v55  ;;  %v3687_v56 = vld [vmem:[#allocation2 + $0x7e0] ss:$16 sps:$4 sm:$0xff]   ;;  %v3690_v55 = vld [vmem:[#allocation2 + $0x7e8] ss:$16 sps:$4 sm:$0xff]  }
 0x189   :  { %2220 = vmatprep.mubr.bf16.mxu0 %v3965_v5  ;;  %2392 = vmatprep.mubr.bf16.mxu1 %v3965_v5  ;;  %v3624_v5 = vld [vmem:[#allocation2 + $0x688] ss:$16 sps:$4 sm:$0xff]  }
 0x18b   :  { %2191 = vmatpush1.bf16.msra.mxu0 %v3603_v57  ;;  %2363 = vmatpush1.bf16.msra.mxu1 %v3606_v58  ;;  %v3693_v57 = vld [vmem:[%s4113_s5 + $0x40] sm:$0xff]  }
 0x18c   :  { %2192 = vmatprep.subr.bf16.mxu0 %v3611_v59  ;;  %2364 = vmatprep.subr.bf16.mxu1 %v3614_v60  ;;  %v3694_v58 = vld [vmem:[%s4113_s5 + $0xc0] sm:$0xff]  }
 0x18d   :  { %v3695_v59 = vld [vmem:[%s4113_s5] sm:$0xff]  }
 0x18e   :  { %v3696_v60 = vld [vmem:[%s4113_s5 + $0x80] sm:$0xff]  }
 0x18f   :  { %2193 = vmatpush1.bf16.msra.mxu0 %v3609_v61  ;;  %2365 = vmatpush1.bf16.msra.mxu1 %v3612_v32  ;;  %v3697_v61 = vld [vmem:[%s4113_s5 + $0x48] sm:$0xff]  }
 0x190   :  { %2194 = vmatprep.subr.bf16.mxu0 %v3617_v7  ;;  %2366 = vmatprep.subr.bf16.mxu1 %v3620_v29  ;;  %v3698_v32 = vld [vmem:[%s4113_s5 + $0xc8] sm:$0xff]  }
 0x191   :  { %v3699_v7 = vld [vmem:[%s4113_s5 + $0x8] sm:$0xff]  }
 0x192   :  { %v3700_v29 = vld [vmem:[%s4113_s5 + $0x88] sm:$0xff]  }
 0x193   :  { %2195 = vmatpush1.bf16.msra.mxu0 %v3615_v62  ;;  %2367 = vmatpush1.bf16.msra.mxu1 %v3618_v63  ;;  %v3701_v62 = vld [vmem:[%s4113_s5 + $0x50] sm:$0xff]  }
 0x194   :  { %2196 = vmatprep.subr.bf16.mxu0 %v3623_v2  ;;  %2368 = vmatprep.subr.bf16.mxu1 %v3626_v3  ;;  %v3703_v63 = vld [vmem:[%s4113_s5 + $0x10] sm:$0xff]   ;;  %v3705_v3 = vld [vmem:[%s4113_s5 + $0x58] sm:$0xff]  }
 0x195   :  { %v3704_v2 = vld [vmem:[%s4113_s5 + $0x90] sm:$0xff]  }
 0x197   :  { %2197 = vmatpush1.bf16.msra.mxu0 %v3621_v4  ;;  %2369 = vmatpush1.bf16.msra.mxu1 %v3624_v5  ;;  %v3706_v4 = vld [vmem:[%s4113_s5 + $0xd8] sm:$0xff]  }
 0x198   :  { %2198 = vmatprep.subr.bf16.mxu0 %v3629_v9  ;;  %2370 = vmatprep.subr.bf16.mxu1 %v3632_v11  ;;  %v3707_v5 = vld [vmem:[%s4113_s5 + $0x18] sm:$0xff]   ;;  %v3709_v11 = vld [vmem:[%s4113_s5 + $0x60] sm:$0xff]  }
 0x199   :  { %v3708_v9 = vld [vmem:[%s4113_s5 + $0x98] sm:$0xff]  }
 0x19b   :  { %2199 = vmatpush1.bf16.msra.mxu0 %v3627_v13  ;;  %2371 = vmatpush1.bf16.msra.mxu1 %v3630_v14  ;;  %v3710_v13 = vld [vmem:[%s4113_s5 + $0xe0] sm:$0xff]  }
 0x19c   :  { %2200 = vmatprep.subr.bf16.mxu0 %v3635_v15  ;;  %2372 = vmatprep.subr.bf16.mxu1 %v3638_v16  ;;  %v3711_v14 = vld [vmem:[%s4113_s5 + $0x20] sm:$0xff]   ;;  %v3713_v16 = vld [vmem:[%s4113_s5 + $0x68] sm:$0xff]  }
 0x19d   :  { %v3712_v15 = vld [vmem:[%s4113_s5 + $0xa0] sm:$0xff]  }
 0x19f   :  { %2201 = vmatpush1.bf16.msra.mxu0 %v3633_v17  ;;  %2373 = vmatpush1.bf16.msra.mxu1 %v3636_v18  ;;  %v3714_v17 = vld [vmem:[%s4113_s5 + $0xe8] sm:$0xff]  }
 0x1a0   :  { %2202 = vmatprep.subr.bf16.mxu0 %v3641_v19  ;;  %2374 = vmatprep.subr.bf16.mxu1 %v3644_v20  ;;  %v3715_v18 = vld [vmem:[%s4113_s5 + $0x28] sm:$0xff]   ;;  %v3717_v20 = vld [vmem:[%s4113_s5 + $0x70] sm:$0xff]  }
 0x1a1   :  { %v3716_v19 = vld [vmem:[%s4113_s5 + $0xa8] sm:$0xff]  }
 0x1a3   :  { %2203 = vmatpush1.bf16.msra.mxu0 %v3639_v21  ;;  %2375 = vmatpush1.bf16.msra.mxu1 %v3642_v22  ;;  %v3718_v21 = vld [vmem:[%s4113_s5 + $0xf0] sm:$0xff]  }
 0x1a4   :  { %2204 = vmatprep.subr.bf16.mxu0 %v3647_v23  ;;  %2376 = vmatprep.subr.bf16.mxu1 %v3650_v24  ;;  %v3719_v22 = vld [vmem:[%s4113_s5 + $0x30] sm:$0xff]   ;;  %v3721_v24 = vld [vmem:[%s4113_s5 + $0x78] sm:$0xff]  }
 0x1a5   :  { %v3720_v23 = vld [vmem:[%s4113_s5 + $0xb0] sm:$0xff]  }
 0x1a7   :  { %2205 = vmatpush1.bf16.msra.mxu0 %v3645_v25  ;;  %2377 = vmatpush1.bf16.msra.mxu1 %v3648_v26  ;;  %v3722_v25 = vld [vmem:[%s4113_s5 + $0xf8] sm:$0xff]  }
 0x1a8   :  { %2206 = vmatprep.subr.bf16.mxu0 %v3653_v27  ;;  %2378 = vmatprep.subr.bf16.mxu1 %v3656_v28  ;;  %v3723_v26 = vld [vmem:[%s4113_s5 + $0x38] sm:$0xff]   ;;  %v757_v28 = vld [vmem:[%s4112_s4] sm:$0xf] }
 0x1a9   :  { %v3724_v27 = vld [vmem:[%s4113_s5 + $0xb8] sm:$0xff]  }
 0x1ab   :  { %2207 = vmatpush1.bf16.msra.mxu0 %v3651_v30  ;;  %2379 = vmatpush1.bf16.msra.mxu1 %v3654_v31  ;;  %v762_v30 = vrot.slane %v757_v28, %v82_v0  ;;  %v770_v31 = vrot.slane %v757_v28, %v90_v10 }
 0x1ac   :  { %2208 = vmatprep.subr.bf16.mxu0 %v3659_v33  ;;  %2380 = vmatprep.subr.bf16.mxu1 %v3662_v34  ;;  %v766_v33 = vrot.slane %v757_v28, %v86_v8  ;;  %v774_v34 = vrot.slane %v757_v28, %v94_v12 }
 0x1af   :  { %2209 = vmatpush1.bf16.msra.mxu0 %v3657_v35  ;;  %2381 = vmatpush1.bf16.msra.mxu1 %v3660_v36 }
 0x1b0   :  { %2210 = vmatprep.subr.bf16.mxu0 %v3665_v37  ;;  %2382 = vmatprep.subr.bf16.mxu1 %v3668_v38 }
 0x1b3   :  { %2211 = vmatpush1.bf16.msra.mxu0 %v3663_v39  ;;  %2383 = vmatpush1.bf16.msra.mxu1 %v3666_v40 }
 0x1b4   :  { %2212 = vmatprep.subr.bf16.mxu0 %v3671_v41  ;;  %2384 = vmatprep.subr.bf16.mxu1 %v3674_v42 }
 0x1b7   :  { %2213 = vmatpush1.bf16.msra.mxu0 %v3669_v43  ;;  %2385 = vmatpush1.bf16.msra.mxu1 %v3672_v44 }
 0x1b8   :  { %2214 = vmatprep.subr.bf16.mxu0 %v3677_v45  ;;  %2386 = vmatprep.subr.bf16.mxu1 %v3680_v46 }
 0x1bb   :  { %2215 = vmatpush1.bf16.msra.mxu0 %v3675_v47  ;;  %2387 = vmatpush1.bf16.msra.mxu1 %v3678_v48 }
 0x1bc   :  { %2216 = vmatprep.subr.bf16.mxu0 %v3683_v49  ;;  %2388 = vmatprep.subr.bf16.mxu1 %v3686_v50 }
 0x1bf   :  { %2217 = vmatpush1.bf16.msra.mxu0 %v3681_v51  ;;  %2389 = vmatpush1.bf16.msra.mxu1 %v3684_v52 }
 0x1c0   :  { %2218 = vmatprep.subr.bf16.mxu0 %v3689_v53  ;;  %2390 = vmatprep.subr.bf16.mxu1 %v3692_v54 }
 0x1c3   :  { %2219 = vmatpush1.bf16.msra.mxu0 %v3687_v56  ;;  %2391 = vmatpush1.bf16.msra.mxu1 %v3690_v55 }
 0x1c4   :  { %3202 = vmatprep.subr.bf16.mxu0 %v3693_v57  ;;  %3224 = vmatprep.subr.bf16.mxu1 %v3694_v58 }
 0x1c6   :  { %2221 = vmatmul.mubr.bf16.vlgmr.msra.gmra.mrb[8].mxu0 %v3963_v1  ;;  %2393 = vmatmul.mubr.bf16.vlgmr.msra.gmra.mrb[8].mxu1 %v3963_v1  ;;  %v3702_v1 = vld [vmem:[%s4113_s5 + $0xd0] sm:$0xff]  }
 0x1c7   :  { %3203 = vmatpush3.bf16.msra.mxu0 %v3695_v59  ;;  %3225 = vmatpush3.bf16.msra.mxu1 %v3696_v60 }
 0x1c8   :  { %3204 = vmatprep.subr.bf16.mxu0 %v3697_v61  ;;  %3226 = vmatprep.subr.bf16.mxu1 %v3698_v32 }
 0x1cb   :  { %3205 = vmatpush3.bf16.msra.mxu0 %v3699_v7  ;;  %3227 = vmatpush3.bf16.msra.mxu1 %v3700_v29 }
 0x1cc   :  { %3206 = vmatprep.subr.bf16.mxu0 %v3701_v62  ;;  %3228 = vmatprep.subr.bf16.mxu1 %v3702_v1  ;;  %v3753_v1 = vmov 0.0|0.0  }
 0x1cf   :  { %3207 = vmatpush3.bf16.msra.mxu0 %v3703_v63  ;;  %3229 = vmatpush3.bf16.msra.mxu1 %v3704_v2  ;;  %v3755_v63 = vmov 0.0  }
 0x1d0   :  { %3208 = vmatprep.subr.bf16.mxu0 %v3705_v3  ;;  %3230 = vmatprep.subr.bf16.mxu1 %v3706_v4  ;;  %v3166_v4 = vld [vmem:[%s4114_s6] ss:$0 sm:$0xff] }
 0x1d3   :  { %3209 = vmatpush3.bf16.msra.mxu0 %v3707_v5  ;;  %3231 = vmatpush3.bf16.msra.mxu1 %v3708_v9 }
 0x1d4   :  { %3210 = vmatprep.subr.bf16.mxu0 %v3709_v11  ;;  %3232 = vmatprep.subr.bf16.mxu1 %v3710_v13 }
 0x1d7   :  { %3211 = vmatpush3.bf16.msra.mxu0 %v3711_v14  ;;  %3233 = vmatpush3.bf16.msra.mxu1 %v3712_v15 }
 0x1d8   :  { %3212 = vmatprep.subr.bf16.mxu0 %v3713_v16  ;;  %3234 = vmatprep.subr.bf16.mxu1 %v3714_v17 }
 0x1db   :  { %3213 = vmatpush3.bf16.msra.mxu0 %v3715_v18  ;;  %3235 = vmatpush3.bf16.msra.mxu1 %v3716_v19 }
 0x1dc   :  { %3214 = vmatprep.subr.bf16.mxu0 %v3717_v20  ;;  %3236 = vmatprep.subr.bf16.mxu1 %v3718_v21 }
 0x1df   :  { %3215 = vmatpush3.bf16.msra.mxu0 %v3719_v22  ;;  %3237 = vmatpush3.bf16.msra.mxu1 %v3720_v23 }
 0x1e0   :  { %3216 = vmatprep.subr.bf16.mxu0 %v3721_v24  ;;  %3238 = vmatprep.subr.bf16.mxu1 %v3722_v25 }
 0x1e3   :  { %3217 = vmatpush3.bf16.msra.mxu0 %v3723_v26  ;;  %3239 = vmatpush3.bf16.msra.mxu1 %v3724_v27 }
 0x1e4   :  { %3264 = vmatprep.subr.bf16.mxu0 %v3753_v1  ;;  %3267 = vmatprep.subr.bf16.mxu1 %v3753_v1 }
 0x299   :  { %v2222_v35 = vpop.f32.mrb[8].mxu0  ;;  %v2394_v36 = vpop.f32.mrb[8].mxu1 }
 0x29a   :  { %v3269_v37 = vadd.f32 %v2222_v35, %v762_v30  ;;  %v3273_v38 = vadd.f32 %v2394_v36, %v770_v31  ;;  %v2224_v39 = vpop.f32.mrb[9].mxu0  ;;  %v2396_v40 = vpop.f32.mrb[9].mxu1 }
 0x29b   :  { %v3270_v41 = vadd.f32 %v2224_v39, %v766_v33  ;;  %v3274_v42 = vadd.f32 %v2396_v40, %v774_v34  ;;  %v2226_v43 = vpop.f32.mrb[10].mxu0  ;;  %v2398_v44 = vpop.f32.mrb[10].mxu1 }
 0x29c   :  { %v2403_v0 = vmul.f32 0.01, %v3269_v37  ;;  %v2405_v45 = vmul.f32 0.01, %v3273_v38  ;;  %v3271_v46 = vadd.f32 %v2226_v43, %v762_v30  ;;  %v3275_v10 = vadd.f32 %v2398_v44, %v770_v31  ;;  %v2228_v47 = vpop.f32.mrb[11].mxu0  ;;  %v2400_v48 = vpop.f32.mrb[11].mxu1 }
 0x29d   :  { %v2404_v8 = vmul.f32 0.01, %v3270_v41  ;;  %v2406_v49 = vmul.f32 0.01, %v3274_v42  ;;  %v3272_v6 = vadd.f32 %v2228_v47, %v766_v33  ;;  %v3276_v12 = vadd.f32 %v2400_v48, %v774_v34  ;;  %v2773_v30 = vld [vmem:[%s4115_s7 + $0x8] sm:$0xff]  ;;  %v2772_v31 = vld [vmem:[%s4115_s7] sm:$0xff] }
 0x29e   :  { %v2407_v50 = vmul.f32 0.01, %v3271_v46  ;;  %v2409_v51 = vmul.f32 0.01, %v3275_v10  ;;  %v2411_v54 = vmax.f32 %v3269_v37, %v2403_v0  ;;  %v2413_v56 = vmax.f32 %v3273_v38, %v2405_v45  ;;  %v2774_v33 = vld [vmem:[%s4115_s7 + $0x10] sm:$0xff] }
 0x29f   :  { %v2408_v52 = vmul.f32 0.01, %v3272_v6  ;;  %v2410_v53 = vmul.f32 0.01, %v3276_v12  ;;  %v2412_v58 = vmax.f32 %v3270_v41, %v2404_v8  ;;  %v2414_v59 = vmax.f32 %v3274_v42, %v2406_v49 }
 0x2a0   :  { %v2415_v55 = vmax.f32 %v3271_v46, %v2407_v50  ;;  %v2417_v57 = vmax.f32 %v3275_v10, %v2409_v51 }
 0x2a1   :  { %v2416_v60 = vmax.f32 %v3272_v6, %v2408_v52  ;;  %v2418_v61 = vmax.f32 %v3276_v12, %v2410_v53 }
 0x2a2   :  { %v2419_v32 = vpack.c.bf16 %v2415_v55, %v2411_v54  ;;  %v2421_v7 = vpack.c.bf16 %v2417_v57, %v2413_v56 }
 0x2a3   :  { %v2420_v29 = vpack.c.bf16 %v2416_v60, %v2412_v58  ;;  %v2422_v62 = vpack.c.bf16 %v2418_v61, %v2414_v59 }
 0x2a5   :  { %2718 = vmatprep.mubr.bf16.mxu0 %v2420_v29  ;;  %2759 = vmatprep.mubr.bf16.mxu1 %v2422_v62 }
 0x2a6   :  { %2719 = vmatmul.mubr.bf16.vlgmr.msra.gmra.mrb[12].mxu0 %v2419_v32  ;;  %2760 = vmatmul.mubr.bf16.vlgmr.msra.gmra.mrb[12].mxu1 %v2421_v7 }
 0x2a7   :  { %3258 = vmatprep.mubr.msk.f32.mxu1 %vm3754_vm1, %v3755_v63  ;;  %3255 = vmatprep.mubr.msk.f32.mxu0 %vm3754_vm1, %v3755_v63 }
 0x379   :  { %v3218_v2 = vpop.f32.mrb[12].mxu0  ;;  %v3240_v3 = vpop.f32.mrb[12].mxu1 }
 0x37a   :  { %v3219_v5 = vpop.f32.mrb[13].mxu0  ;;  %v3241_v9 = vpop.f32.mrb[13].mxu1 }
 0x37b   :  { %v3220_v11 = vadd.f32 %v3219_v5, %v3218_v2  ;;  %v3242_v13 = vadd.f32 %v3241_v9, %v3240_v3  ;;  %v3221_v14 = vpop.f32.mrb[14].mxu0  ;;  %v3243_v15 = vpop.f32.mrb[14].mxu1 }
 0x37c   :  { %v3222_v16 = vpop.f32.mrb[15].mxu0  ;;  %v3244_v17 = vpop.f32.mrb[15].mxu1 }
 0x37d   :  { %v2721_v18 = vadd.f32 %v3220_v11, %v3166_v4  ;;  %v3223_v19 = vadd.f32 %v3222_v16, %v3221_v14  ;;  %v3245_v20 = vadd.f32 %v3244_v17, %v3243_v15 }
 0x37f   :  { %v2762_v21 = vadd.f32 %v3242_v13, %v2721_v18  ;;  %v2724_v22 = vadd.f32 %v3223_v19, %v3166_v4 }
 0x381   :  { %v2768_v23 = vmul.f32 0.01, %v2762_v21  ;;  %v2765_v24 = vadd.f32 %v3245_v20, %v2724_v22 }
 0x383   :  { %v2769_v25 = vmul.f32 0.01, %v2765_v24  ;;  %v2770_v26 = vmax.f32 %v2762_v21, %v2768_v23 }
 0x385   :  { %v2771_v27 = vmax.f32 %v2765_v24, %v2769_v25 }
 0x387   :  { %v3265_v28 = vpack.c.bf16 %v2771_v27, %v2770_v26 }
 0x389   :  { %3266 = vmatpush3.bf16.msra.mxu0 %v3265_v28  ;;  %3268 = vmatpush3.bf16.msra.mxu1 %v3265_v28 }
 0x38c   :  { %3259 = vmatmul.mubr.msk.f32.vlgmr.msra.gmra.mrb[16].mxu1 %vm2775_vm2, %v2773_v30  ;;  %3256 = vmatmul.mubr.msk.f32.vlgmr.msra.gmra.mrb[16].mxu0 %vm2775_vm2, %v2772_v31 }
 0x38d   :  { %3261 = vmatprep.mubr.msk.f32.mxu1 %vm3754_vm1, %v3755_v63 }
 0x390   :  { %3262 = vmatmul.mubr.msk.f32.gmra.mrb[18].mxu1 %vm2775_vm2, %v2774_v33 }
 0x45f   :  { %v2856_v34 = vpop.f32.mrb[16].mxu1  ;;  %v2851_v35 = vpop.f32.mrb[16].mxu0 }
 0x460   :  { %2866 = vst.msk [vmem:[%s4116_s8 + $0x8] sm:$0xff] %vm2775_vm2, %v2856_v34  ;;  %v3260_v36 = vpop.f32.mrb[17].mxu1  ;;  %2865 = vst.msk [vmem:[%s4116_s8] sm:$0xff] %vm2775_vm2, %v2851_v35  ;;  %v3257_v37 = vpop.f32.mrb[17].mxu0 }
 0x463   :  { %v2861_v38 = vpop.f32.mrb[18].mxu1 }
 0x464   :  { %2867 = vst.msk [vmem:[%s4116_s8 + $0x10] sm:$0xff] %vm2775_vm2, %v2861_v38  ;;  %v3263_v39 = vpop.f32.mrb[19].mxu1 }
 0x465   :  { %2872 = vsyncpa [#allocation3], 1 }

</bundles_post_ra>
